<compile_context>
chip_gen: v7x
topology: tpu7x:2x2x1
jax: 0.10.0
libtpu: 0.0.40
codegen_flags: <defaults>
</compile_context>

<pallas_src>
import functools

import jax
import jax.numpy as jnp
from jax import lax
from jax.experimental import pallas as pl
from jax.experimental.pallas import tpu as pltpu

_NEG = -1e30  # finite "-inf": exp() underflows to exactly 0.0 in f32


def _crf_denominator_kernel(em0_ref, e1_ref, e2_ref, em_ref, mask_ref,
                            out_ref, score_ref, *, tchunk, beam):
    """One (batch-block, time-chunk) grid step of the beam log-normalizer.

    Block layouts (leading batch-block axis indexed away with [0]):
      em0_ref  : (1, tb, 1, beam)          f32   emissions at t=0
      e1_ref   : (1, tb, TCHUNK, beam, R)  bf16  source factors E1
      e2_ref   : (1, tb, TCHUNK, beam, R)  bf16  dest factors   E2
      em_ref   : (1, tb, TCHUNK, beam)     f32   dest emissions per step
      mask_ref : (1, tb, TCHUNK, 1)        f32   step mask (no beam replication)
      out_ref  : (1, tb, 1, 1)             f32   final logsumexp over the beam
      score_ref: (tb, 1, beam)             f32   VMEM carry across time chunks
    """
    c = pl.program_id(1)
    n_c = pl.num_programs(1)

    # log-identity transition for masked (padding) steps: 0 diag, -1e30 off.
    ii = lax.broadcasted_iota(jnp.int32, (beam, beam), 0)
    jj = lax.broadcasted_iota(jnp.int32, (beam, beam), 1)
    log_eye = jnp.where(ii == jj, 0.0, _NEG).astype(jnp.float32)    # (beam, beam)

    @pl.when(c == 0)
    def _():
        score_ref[...] = em0_ref[0]                                 # (tb, 1, beam)

    # Dest emissions with the beam index on sublanes (needed at even steps
    # below); one XLU transpose per chunk, off the serial chain.
    em_sub = jnp.swapaxes(em_ref[0], -1, -2)                        # (tb, beam, TCHUNK)

    # Running forward score.  Orientation alternates each step:
    #   even i: score is (tb, 1, beam) -> source index j on the LANE axis
    #   odd  i: score is (tb, beam, 1) -> source index j on the SUBLANE axis
    # TCHUNK is even, so the carry is always (tb, 1, beam) at chunk boundaries.
    score = score_ref[...]                                          # (tb, 1, beam)

    for i in range(tchunk):
        e1_i = e1_ref[0, :, i]                                      # (tb, beam, R) src j
        e2_i = e2_ref[0, :, i]                                      # (tb, beam, R) dst k
        m_i = mask_ref[0, :, i:i + 1, :]                            # (tb, 1, 1)
        if i % 2 == 0:
            # source j on lanes -> trans oriented [k, j]; reduce over lanes.
            tr = jnp.einsum('bkr,bjr->bkj', e2_i, e1_i,
                            preferred_element_type=jnp.float32)     # (tb, k, j)
            em_i = em_sub[:, :, i:i + 1]                            # (tb, k, 1)
            red_axis = -1
        else:
            # source j on sublanes -> trans oriented [j, k]; reduce over sublanes.
            tr = jnp.einsum('bjr,bkr->bjk', e1_i, e2_i,
                            preferred_element_type=jnp.float32)     # (tb, j, k)
            em_i = em_ref[0, :, i:i + 1, :]                         # (tb, 1, k)
            red_axis = -2
        # Masked step => identity transition (exact carry, just re-oriented)
        # and the dest emission is dropped, matching torch.where(mask, ...).
        t = jnp.where(m_i > 0.5, tr + em_i, log_eye)
        x = t + score                                               # broadcast over dest axis
        mx = jnp.max(x, axis=red_axis, keepdims=True)
        score = mx + jnp.log(jnp.sum(jnp.exp(x - mx), axis=red_axis,
                                     keepdims=True))

    score_ref[...] = score                                          # (tb, 1, beam)

    @pl.when(c == n_c - 1)
    def _():
        mx = jnp.max(score, axis=-1, keepdims=True)
        out_ref[0] = mx + jnp.log(jnp.sum(jnp.exp(score - mx), axis=-1,
                                          keepdims=True))           # (tb, 1, 1)


def _crf_denominator(em0, e1, e2, em_dst, maskm, *, tchunk, beam, tb):
    n_b = em0.shape[0]
    tp1 = e1.shape[2]
    r = e1.shape[-1]
    n_c = tp1 // tchunk
    kernel = functools.partial(_crf_denominator_kernel, tchunk=tchunk,
                               beam=beam)
    out = pl.pallas_call(
        kernel,
        out_shape=jax.ShapeDtypeStruct((n_b, tb, 1, 1), jnp.float32),
        grid=(n_b, n_c),
        in_specs=[
            pl.BlockSpec((1, tb, 1, beam), lambda g, c: (g, 0, 0, 0)),
            pl.BlockSpec((1, tb, tchunk, beam, r), lambda g, c: (g, 0, c, 0, 0)),
            pl.BlockSpec((1, tb, tchunk, beam, r), lambda g, c: (g, 0, c, 0, 0)),
            pl.BlockSpec((1, tb, tchunk, beam), lambda g, c: (g, 0, c, 0)),
            pl.BlockSpec((1, tb, tchunk, 1), lambda g, c: (g, 0, c, 0)),
        ],
        out_specs=pl.BlockSpec((1, tb, 1, 1), lambda g, c: (g, 0, 0, 0)),
        scratch_shapes=[pltpu.VMEM((tb, 1, beam), jnp.float32)],
        compiler_params=pltpu.CompilerParams(
            dimension_semantics=("parallel", "arbitrary")),
    )(em0, e1, e2, em_dst, maskm)
    return out.reshape(n_b * tb)


@functools.partial(jax.jit, static_argnames=("beam",))
def crf_forward(E1, E2, emissions, targets, masks, *, beam):
    """CRF.forward(emissions, targets, masks) -> (B,) float32."""
    B, T, V = emissions.shape
    rank = E1.shape[1]
    maskf = masks.astype(jnp.float32)

    # ---------------- numerator (_compute_score): plain JAX ----------------
    lg = jnp.take_along_axis(emissions, targets[:, :, None], axis=2)[:, :, 0]
    tr_gold = jnp.sum(E1[targets[:, :-1]] * E2[targets[:, 1:]], axis=-1)
    lg = lg.at[:, 1:].add(tr_gold)
    numerator = jnp.sum(lg * maskf, axis=-1)                        # (B,)

    # ---------------- beam selection: plain-JAX glue ----------------
    # TODO(synk): vocab top-k and the data-dependent E1/E2 gathers stay in XLA;
    # keeping E1/E2 resident in VMEM and gathering per step in-kernel (from
    # int32 beam_targets) would cut kernel HBM reads ~30x but needs an
    # in-kernel gather path that is not portable across generations yet.
    bidx = jnp.arange(B)[:, None]
    tidx = jnp.arange(T)[None, :]
    _em = emissions.at[bidx, tidx, targets].set(jnp.inf)
    _, beam_targets = lax.top_k(_em, beam)                          # (B, T, beam)
    em_beam = jnp.take_along_axis(emissions, beam_targets,
                                  axis=2).astype(jnp.float32)       # (B, T, beam)

    # ---------------- tiling choices ----------------
    # tb: batch rows per grid step; keep >= 2 batch blocks so the "parallel"
    # axis can shard across both TensorCores on v7x.
    tb = min(16, max(1, -(-B // 2)))
    n_b = -(-B // tb)
    Bp = n_b * tb
    # tchunk: time steps per grid step (even + multiple of 8 for block tiling);
    # bounded VMEM per grid step (~<10 MB) on every generation.
    n_steps = max(T - 1, 1)
    if n_steps <= 8:
        tchunk = 8
    elif n_steps <= 16:
        tchunk = 16
    else:
        tchunk = 32
    tp1 = -(-n_steps // tchunk) * tchunk                            # padded step count
    Tp = tp1 + 1

    # Pad the SMALL per-step tensors (indices / beam emissions / mask) before
    # the embedding gathers, so the large factor tensors are born at padded
    # shape: no pad-copy and no transpose of the big operands anywhere.
    pad_b, pad_t = Bp - B, Tp - T
    beam_targets = jnp.pad(beam_targets, ((0, pad_b), (0, pad_t), (0, 0)))
    em_beam = jnp.pad(em_beam, ((0, pad_b), (0, pad_t), (0, 0)))
    maskp = jnp.pad(maskf, ((0, pad_b), (0, pad_t)))

    e1 = E1[beam_targets[:, :-1]].astype(jnp.bfloat16)              # (Bp, Tp-1, beam, R)
    e2 = E2[beam_targets[:, 1:]].astype(jnp.bfloat16)               # (Bp, Tp-1, beam, R)

    # Pure reshapes (zero copy) into (batch-block, tb, ...) layout.
    em0 = em_beam[:, 0, :].reshape(n_b, tb, 1, beam)
    em_dst = em_beam[:, 1:, :].reshape(n_b, tb, tp1, beam)
    e1 = e1.reshape(n_b, tb, tp1, beam, rank)
    e2 = e2.reshape(n_b, tb, tp1, beam, rank)
    maskm = maskp[:, 1:].reshape(n_b, tb, tp1, 1)

    den = _crf_denominator(em0, e1, e2, em_dst, maskm,
                           tchunk=tchunk, beam=beam, tb=tb)[:B]
    return numerator - den


def crf_forward_ref(E1, E2, emissions, targets, masks, *, beam):
    """Pure-JAX reference mirroring the PyTorch module (f32 throughout)."""
    B, T, V = emissions.shape
    lg = jnp.take_along_axis(emissions, targets[:, :, None], axis=2)[:, :, 0]
    trans = jnp.sum(E1[targets[:, :-1]] * E2[targets[:, 1:]], axis=-1)
    lg = lg.at[:, 1:].add(trans)
    num = (lg * masks.astype(lg.dtype)).sum(-1)
    bidx = jnp.arange(B)[:, None]
    tidx = jnp.arange(T)[None, :]
    _em = emissions.at[bidx, tidx, targets].set(jnp.inf)
    _, beam_targets = lax.top_k(_em, beam)
    bes = jnp.take_along_axis(emissions, beam_targets, axis=2)
    e1b = E1[beam_targets[:, :-1]]
    e2b = E2[beam_targets[:, 1:]]
    btm = jnp.einsum('btjr,btkr->btjk', e1b, e2b)
    score = bes[:, 0]
    for i in range(1, T):
        nxt = jax.nn.logsumexp(score[:, :, None] + btm[:, i - 1], axis=1) + bes[:, i]
        score = jnp.where(masks[:, i:i + 1], nxt, score)
    den = jax.nn.logsumexp(score, axis=1)
    return num - den


if __name__ == "__main__":
    B, T, V, BEAM, RANK = 2, 8, 128, 64, 32

    key = jax.random.PRNGKey(0)
    k1, k2, k3, k4 = jax.random.split(key, 4)
    # deterministic synthetic "embedding" parameters (nn.Embedding shapes)
    E1 = jax.random.normal(k1, (V, RANK), jnp.float32) * 0.1
    E2 = jax.random.normal(k2, (V, RANK), jnp.float32) * 0.1

    emissions = jax.random.normal(k3, (B, T, V), jnp.float32)
    targets = jax.random.randint(k4, (B, T), 0, V)
    lengths = jnp.array([T, T - 3])
    masks = (jnp.arange(T)[None, :] < lengths[:, None])              # (B, T) bool

    out = crf_forward(E1, E2, emissions, targets, masks, beam=BEAM)
    out = jax.block_until_ready(out)

    ref = crf_forward_ref(E1, E2, emissions, targets, masks, beam=BEAM)
    assert out.shape == (B,)
    assert jnp.allclose(out, ref, atol=1e-2, rtol=1e-3), (out, ref)

    print("KERNEL_OK")
</pallas_src>

<mosaic_0001>
module attributes {stable_mosaic.version = 11 : i64} {
  func.func @_crf_denominator_kernel(%arg0: i32, %arg1: i32, %arg2: memref<1x1x1x64xf32, #tpu.memory_space<vmem>>, %arg3: memref<1x1x8x64x32xbf16, #tpu.memory_space<vmem>>, %arg4: memref<1x1x8x64x32xbf16, #tpu.memory_space<vmem>>, %arg5: memref<1x1x8x64xf32, #tpu.memory_space<vmem>>, %arg6: memref<1x1x8x1xf32, #tpu.memory_space<vmem>>, %arg7: memref<1x1x1x1xf32, #tpu.memory_space<vmem>>, %arg8: memref<1x1x64xf32, #tpu.memory_space<vmem>>) attributes {dimension_semantics = [#tpu.dimension_semantics<parallel>, #tpu.dimension_semantics<arbitrary>], iteration_bounds = array<i64: 2, 1>, scalar_prefetch = 0 : i64, scratch_operands = 1 : i64, tpu.core_type = #tpu.core_type<tc>, window_params = [{transform_indices = @transform_0, window_bounds = array<i64: 1, 1, 1, 64>}, {transform_indices = @transform_1, window_bounds = array<i64: 1, 1, 8, 64, 32>}, {transform_indices = @transform_2, window_bounds = array<i64: 1, 1, 8, 64, 32>}, {transform_indices = @transform_3, window_bounds = array<i64: 1, 1, 8, 64>}, {transform_indices = @transform_4, window_bounds = array<i64: 1, 1, 8, 1>}, {transform_indices = @transform_5, window_bounds = array<i64: 1, 1, 1, 1>}]} {
    %0 = tpu.iota {dimensions = array<i32: 0>} : vector<64x64xi32>
    %1 = tpu.iota {dimensions = array<i32: 1>} : vector<64x64xi32>
    %2 = arith.cmpi eq, %0, %1 : vector<64x64xi32>
    %cst = arith.constant 0.000000e+00 : f32
    %cst_0 = arith.constant -1.000000e+30 : f32
    %3 = vector.broadcast %cst : f32 to vector<64x64xf32>
    %4 = vector.broadcast %cst_0 : f32 to vector<64x64xf32>
    %5 = arith.select %2, %3, %4 : vector<64x64xi1>, vector<64x64xf32>
    %c0_i32 = arith.constant 0 : i32
    %6 = arith.cmpi eq, %arg1, %c0_i32 : i32
    %7 = arith.extui %6 : i1 to i32
    %c0_i32_1 = arith.constant 0 : i32
    %8 = arith.cmpi ne, %7, %c0_i32_1 : i32
    scf.if %8 {
      %c0_166 = arith.constant 0 : index
      %c0_167 = arith.constant 0 : index
      %c0_168 = arith.constant 0 : index
      %c0_169 = arith.constant 0 : index
      %237 = vector.load %arg2[%c0_166, %c0_167, %c0_168, %c0_169] : memref<1x1x1x64xf32, #tpu.memory_space<vmem>>, vector<1x1x1x64xf32>
      %238 = vector.shape_cast %237 : vector<1x1x1x64xf32> to vector<1x1x64xf32>
      %c0_170 = arith.constant 0 : index
      %c0_171 = arith.constant 0 : index
      %c0_172 = arith.constant 0 : index
      %239 = vector.load %arg8[%c0_170, %c0_171, %c0_172] : memref<1x1x64xf32, #tpu.memory_space<vmem>>, vector<1x1x64xf32>
      tpu.vector_store %arg8[%c0_170, %c0_171, %c0_172], %238 {strides = array<i32>} : memref<1x1x64xf32, #tpu.memory_space<vmem>>, vector<1x1x64xf32>,
    } else {
    }
    %c0 = arith.constant 0 : index
    %c0_2 = arith.constant 0 : index
    %c0_3 = arith.constant 0 : index
    %c0_4 = arith.constant 0 : index
    %9 = vector.load %arg5[%c0, %c0_2, %c0_3, %c0_4] : memref<1x1x8x64xf32, #tpu.memory_space<vmem>>, vector<1x1x8x64xf32>
    %10 = vector.shape_cast %9 : vector<1x1x8x64xf32> to vector<1x8x64xf32>
    %11 = tpu.transpose %10, [0, 2, 1] : vector<1x8x64xf32> -> vector<1x64x8xf32>
    %c0_5 = arith.constant 0 : index
    %c0_6 = arith.constant 0 : index
    %c0_7 = arith.constant 0 : index
    %12 = vector.load %arg8[%c0_5, %c0_6, %c0_7] : memref<1x1x64xf32, #tpu.memory_space<vmem>>, vector<1x1x64xf32>
    %c0_8 = arith.constant 0 : index
    %c0_9 = arith.constant 0 : index
    %c0_10 = arith.constant 0 : index
    %c0_11 = arith.constant 0 : index
    %c0_12 = arith.constant 0 : index
    %13 = vector.load %arg3[%c0_8, %c0_9, %c0_10, %c0_11, %c0_12] : memref<1x1x8x64x32xbf16, #tpu.memory_space<vmem>>, vector<1x1x1x64x32xbf16>
    %14 = vector.shape_cast %13 : vector<1x1x1x64x32xbf16> to vector<1x64x32xbf16>
    %c0_13 = arith.constant 0 : index
    %c0_14 = arith.constant 0 : index
    %c0_15 = arith.constant 0 : index
    %c0_16 = arith.constant 0 : index
    %c0_17 = arith.constant 0 : index
    %15 = vector.load %arg4[%c0_13, %c0_14, %c0_15, %c0_16, %c0_17] : memref<1x1x8x64x32xbf16, #tpu.memory_space<vmem>>, vector<1x1x1x64x32xbf16>
    %16 = vector.shape_cast %15 : vector<1x1x1x64x32xbf16> to vector<1x64x32xbf16>
    %c0_18 = arith.constant 0 : index
    %c0_19 = arith.constant 0 : index
    %c0_20 = arith.constant 0 : index
    %c0_21 = arith.constant 0 : index
    %17 = vector.load %arg6[%c0_18, %c0_19, %c0_20, %c0_21] : memref<1x1x8x1xf32, #tpu.memory_space<vmem>>, vector<1x1x1x1xf32>
    %18 = vector.shape_cast %17 : vector<1x1x1x1xf32> to vector<1x1x1xf32>
    "tpu.trace_start"() <{level = 10 : i32, message = "bkr,bjr->bkj"}> : () -> ()
    %cst_22 = arith.constant dense<0.000000e+00> : vector<1x64x64xf32>
    %19 = tpu.matmul %16, %14, %cst_22 {dimension_numbers = #tpu.dot_dimension_numbers<[2], [2], [1], [1], [0, 0, 0, 1, 1, 1], [0], [0]>} : vector<1x64x32xbf16>, vector<1x64x32xbf16>, vector<1x64x64xf32> -> vector<1x64x64xf32>
    "tpu.trace_stop"() : () -> ()
    %20 = vector.extract_strided_slice %11 {offsets = [0, 0, 0], sizes = [1, 64, 1], strides = [1, 1, 1]} : vector<1x64x8xf32> to vector<1x64x1xf32>
    %cst_23 = arith.constant 5.000000e-01 : f32
    %21 = vector.broadcast %cst_23 : f32 to vector<1x1x1xf32>
    %22 = arith.cmpf ogt, %18, %21 : vector<1x1x1xf32>
    %23 = vector.broadcast %20 : vector<1x64x1xf32> to vector<1x64x64xf32>
    %24 = arith.addf %19, %23 : vector<1x64x64xf32>
    %25 = vector.shape_cast %22 : vector<1x1x1xi1> to vector<1x1x1xi1>
    %26 = vector.broadcast %25 : vector<1x1x1xi1> to vector<1x64x64xi1>
    %27 = vector.shape_cast %5 : vector<64x64xf32> to vector<1x64x64xf32>
    %28 = arith.select %26, %24, %27 : vector<1x64x64xi1>, vector<1x64x64xf32>
    %29 = vector.broadcast %12 : vector<1x1x64xf32> to vector<1x64x64xf32>
    %30 = arith.addf %28, %29 : vector<1x64x64xf32>
    %cst_24 = arith.constant dense<0xFF800000> : vector<1x64xf32>
    %31 = vector.multi_reduction <maximumf>, %30, %cst_24 [2] : vector<1x64x64xf32> to vector<1x64xf32>
    %32 = vector.shape_cast %31 : vector<1x64xf32> to vector<1x64x1xf32>
    %33 = vector.broadcast %32 : vector<1x64x1xf32> to vector<1x64x64xf32>
    %34 = arith.subf %30, %33 : vector<1x64x64xf32>
    %35 = math.exp %34 : vector<1x64x64xf32>
    %cst_25 = arith.constant dense<0.000000e+00> : vector<1x64xf32>
    %36 = vector.multi_reduction <add>, %35, %cst_25 [2] : vector<1x64x64xf32> to vector<1x64xf32>
    %37 = vector.shape_cast %36 : vector<1x64xf32> to vector<1x64x1xf32>
    %38 = math.log %37 : vector<1x64x1xf32>
    %39 = arith.addf %32, %38 : vector<1x64x1xf32>
    %c0_26 = arith.constant 0 : index
    %c0_27 = arith.constant 0 : index
    %c1 = arith.constant 1 : index
    %c0_28 = arith.constant 0 : index
    %c0_29 = arith.constant 0 : index
    %40 = vector.load %arg3[%c0_26, %c0_27, %c1, %c0_28, %c0_29] : memref<1x1x8x64x32xbf16, #tpu.memory_space<vmem>>, vector<1x1x1x64x32xbf16>
    %41 = vector.shape_cast %40 : vector<1x1x1x64x32xbf16> to vector<1x64x32xbf16>
    %c0_30 = arith.constant 0 : index
    %c0_31 = arith.constant 0 : index
    %c1_32 = arith.constant 1 : index
    %c0_33 = arith.constant 0 : index
    %c0_34 = arith.constant 0 : index
    %42 = vector.load %arg4[%c0_30, %c0_31, %c1_32, %c0_33, %c0_34] : memref<1x1x8x64x32xbf16, #tpu.memory_space<vmem>>, vector<1x1x1x64x32xbf16>
    %43 = vector.shape_cast %42 : vector<1x1x1x64x32xbf16> to vector<1x64x32xbf16>
    %c0_35 = arith.constant 0 : index
    %c0_36 = arith.constant 0 : index
    %c1_37 = arith.constant 1 : index
    %c0_38 = arith.constant 0 : index
    %44 = vector.load %arg6[%c0_35, %c0_36, %c1_37, %c0_38] : memref<1x1x8x1xf32, #tpu.memory_space<vmem>>, vector<1x1x1x1xf32>
    %45 = vector.shape_cast %44 : vector<1x1x1x1xf32> to vector<1x1x1xf32>
    "tpu.trace_start"() <{level = 10 : i32, message = "bjr,bkr->bjk"}> : () -> ()
    %cst_39 = arith.constant dense<0.000000e+00> : vector<1x64x64xf32>
    %46 = tpu.matmul %41, %43, %cst_39 {dimension_numbers = #tpu.dot_dimension_numbers<[2], [2], [1], [1], [0, 0, 0, 1, 1, 1], [0], [0]>} : vector<1x64x32xbf16>, vector<1x64x32xbf16>, vector<1x64x64xf32> -> vector<1x64x64xf32>
    "tpu.trace_stop"() : () -> ()
    %c0_40 = arith.constant 0 : index
    %c0_41 = arith.constant 0 : index
    %c1_42 = arith.constant 1 : index
    %c0_43 = arith.constant 0 : index
    %47 = vector.load %arg5[%c0_40, %c0_41, %c1_42, %c0_43] : memref<1x1x8x64xf32, #tpu.memory_space<vmem>>, vector<1x1x1x64xf32>
    %48 = vector.shape_cast %47 : vector<1x1x1x64xf32> to vector<1x1x64xf32>
    %cst_44 = arith.constant 5.000000e-01 : f32
    %49 = vector.broadcast %cst_44 : f32 to vector<1x1x1xf32>
    %50 = arith.cmpf ogt, %45, %49 : vector<1x1x1xf32>
    %51 = vector.broadcast %48 : vector<1x1x64xf32> to vector<1x64x64xf32>
    %52 = arith.addf %46, %51 : vector<1x64x64xf32>
    %53 = vector.shape_cast %50 : vector<1x1x1xi1> to vector<1x1x1xi1>
    %54 = vector.broadcast %53 : vector<1x1x1xi1> to vector<1x64x64xi1>
    %55 = vector.shape_cast %5 : vector<64x64xf32> to vector<1x64x64xf32>
    %56 = arith.select %54, %52, %55 : vector<1x64x64xi1>, vector<1x64x64xf32>
    %57 = vector.broadcast %39 : vector<1x64x1xf32> to vector<1x64x64xf32>
    %58 = arith.addf %56, %57 : vector<1x64x64xf32>
    %cst_45 = arith.constant dense<0xFF800000> : vector<1x64xf32>
    %59 = vector.multi_reduction <maximumf>, %58, %cst_45 [1] : vector<1x64x64xf32> to vector<1x64xf32>
    %60 = vector.shape_cast %59 : vector<1x64xf32> to vector<1x1x64xf32>
    %61 = vector.broadcast %60 : vector<1x1x64xf32> to vector<1x64x64xf32>
    %62 = arith.subf %58, %61 : vector<1x64x64xf32>
    %63 = math.exp %62 : vector<1x64x64xf32>
    %cst_46 = arith.constant dense<0.000000e+00> : vector<1x64xf32>
    %64 = vector.multi_reduction <add>, %63, %cst_46 [1] : vector<1x64x64xf32> to vector<1x64xf32>
    %65 = vector.shape_cast %64 : vector<1x64xf32> to vector<1x1x64xf32>
    %66 = math.log %65 : vector<1x1x64xf32>
    %67 = arith.addf %60, %66 : vector<1x1x64xf32>
    %c0_47 = arith.constant 0 : index
    %c0_48 = arith.constant 0 : index
    %c2 = arith.constant 2 : index
    %c0_49 = arith.constant 0 : index
    %c0_50 = arith.constant 0 : index
    %68 = vector.load %arg3[%c0_47, %c0_48, %c2, %c0_49, %c0_50] : memref<1x1x8x64x32xbf16, #tpu.memory_space<vmem>>, vector<1x1x1x64x32xbf16>
    %69 = vector.shape_cast %68 : vector<1x1x1x64x32xbf16> to vector<1x64x32xbf16>
    %c0_51 = arith.constant 0 : index
    %c0_52 = arith.constant 0 : index
    %c2_53 = arith.constant 2 : index
    %c0_54 = arith.constant 0 : index
    %c0_55 = arith.constant 0 : index
    %70 = vector.load %arg4[%c0_51, %c0_52, %c2_53, %c0_54, %c0_55] : memref<1x1x8x64x32xbf16, #tpu.memory_space<vmem>>, vector<1x1x1x64x32xbf16>
    %71 = vector.shape_cast %70 : vector<1x1x1x64x32xbf16> to vector<1x64x32xbf16>
    %c0_56 = arith.constant 0 : index
    %c0_57 = arith.constant 0 : index
    %c2_58 = arith.constant 2 : index
    %c0_59 = arith.constant 0 : index
    %72 = vector.load %arg6[%c0_56, %c0_57, %c2_58, %c0_59] : memref<1x1x8x1xf32, #tpu.memory_space<vmem>>, vector<1x1x1x1xf32>
    %73 = vector.shape_cast %72 : vector<1x1x1x1xf32> to vector<1x1x1xf32>
    "tpu.trace_start"() <{level = 10 : i32, message = "bkr,bjr->bkj"}> : () -> ()
    %cst_60 = arith.constant dense<0.000000e+00> : vector<1x64x64xf32>
    %74 = tpu.matmul %71, %69, %cst_60 {dimension_numbers = #tpu.dot_dimension_numbers<[2], [2], [1], [1], [0, 0, 0, 1, 1, 1], [0], [0]>} : vector<1x64x32xbf16>, vector<1x64x32xbf16>, vector<1x64x64xf32> -> vector<1x64x64xf32>
    "tpu.trace_stop"() : () -> ()
    %75 = vector.extract_strided_slice %11 {offsets = [0, 0, 2], sizes = [1, 64, 1], strides = [1, 1, 1]} : vector<1x64x8xf32> to vector<1x64x1xf32>
    %cst_61 = arith.constant 5.000000e-01 : f32
    %76 = vector.broadcast %cst_61 : f32 to vector<1x1x1xf32>
    %77 = arith.cmpf ogt, %73, %76 : vector<1x1x1xf32>
    %78 = vector.broadcast %75 : vector<1x64x1xf32> to vector<1x64x64xf32>
    %79 = arith.addf %74, %78 : vector<1x64x64xf32>
    %80 = vector.shape_cast %77 : vector<1x1x1xi1> to vector<1x1x1xi1>
    %81 = vector.broadcast %80 : vector<1x1x1xi1> to vector<1x64x64xi1>
    %82 = vector.shape_cast %5 : vector<64x64xf32> to vector<1x64x64xf32>
    %83 = arith.select %81, %79, %82 : vector<1x64x64xi1>, vector<1x64x64xf32>
    %84 = vector.broadcast %67 : vector<1x1x64xf32> to vector<1x64x64xf32>
    %85 = arith.addf %83, %84 : vector<1x64x64xf32>
    %cst_62 = arith.constant dense<0xFF800000> : vector<1x64xf32>
    %86 = vector.multi_reduction <maximumf>, %85, %cst_62 [2] : vector<1x64x64xf32> to vector<1x64xf32>
    %87 = vector.shape_cast %86 : vector<1x64xf32> to vector<1x64x1xf32>
    %88 = vector.broadcast %87 : vector<1x64x1xf32> to vector<1x64x64xf32>
    %89 = arith.subf %85, %88 : vector<1x64x64xf32>
    %90 = math.exp %89 : vector<1x64x64xf32>
    %cst_63 = arith.constant dense<0.000000e+00> : vector<1x64xf32>
    %91 = vector.multi_reduction <add>, %90, %cst_63 [2] : vector<1x64x64xf32> to vector<1x64xf32>
    %92 = vector.shape_cast %91 : vector<1x64xf32> to vector<1x64x1xf32>
    %93 = math.log %92 : vector<1x64x1xf32>
    %94 = arith.addf %87, %93 : vector<1x64x1xf32>
    %c0_64 = arith.constant 0 : index
    %c0_65 = arith.constant 0 : index
    %c3 = arith.constant 3 : index
    %c0_66 = arith.constant 0 : index
    %c0_67 = arith.constant 0 : index
    %95 = vector.load %arg3[%c0_64, %c0_65, %c3, %c0_66, %c0_67] : memref<1x1x8x64x32xbf16, #tpu.memory_space<vmem>>, vector<1x1x1x64x32xbf16>
    %96 = vector.shape_cast %95 : vector<1x1x1x64x32xbf16> to vector<1x64x32xbf16>
    %c0_68 = arith.constant 0 : index
    %c0_69 = arith.constant 0 : index
    %c3_70 = arith.constant 3 : index
    %c0_71 = arith.constant 0 : index
    %c0_72 = arith.constant 0 : index
    %97 = vector.load %arg4[%c0_68, %c0_69, %c3_70, %c0_71, %c0_72] : memref<1x1x8x64x32xbf16, #tpu.memory_space<vmem>>, vector<1x1x1x64x32xbf16>
    %98 = vector.shape_cast %97 : vector<1x1x1x64x32xbf16> to vector<1x64x32xbf16>
    %c0_73 = arith.constant 0 : index
    %c0_74 = arith.constant 0 : index
    %c3_75 = arith.constant 3 : index
    %c0_76 = arith.constant 0 : index
    %99 = vector.load %arg6[%c0_73, %c0_74, %c3_75, %c0_76] : memref<1x1x8x1xf32, #tpu.memory_space<vmem>>, vector<1x1x1x1xf32>
    %100 = vector.shape_cast %99 : vector<1x1x1x1xf32> to vector<1x1x1xf32>
    "tpu.trace_start"() <{level = 10 : i32, message = "bjr,bkr->bjk"}> : () -> ()
    %cst_77 = arith.constant dense<0.000000e+00> : vector<1x64x64xf32>
    %101 = tpu.matmul %96, %98, %cst_77 {dimension_numbers = #tpu.dot_dimension_numbers<[2], [2], [1], [1], [0, 0, 0, 1, 1, 1], [0], [0]>} : vector<1x64x32xbf16>, vector<1x64x32xbf16>, vector<1x64x64xf32> -> vector<1x64x64xf32>
    "tpu.trace_stop"() : () -> ()
    %c0_78 = arith.constant 0 : index
    %c0_79 = arith.constant 0 : index
    %c3_80 = arith.constant 3 : index
    %c0_81 = arith.constant 0 : index
    %102 = vector.load %arg5[%c0_78, %c0_79, %c3_80, %c0_81] : memref<1x1x8x64xf32, #tpu.memory_space<vmem>>, vector<1x1x1x64xf32>
    %103 = vector.shape_cast %102 : vector<1x1x1x64xf32> to vector<1x1x64xf32>
    %cst_82 = arith.constant 5.000000e-01 : f32
    %104 = vector.broadcast %cst_82 : f32 to vector<1x1x1xf32>
    %105 = arith.cmpf ogt, %100, %104 : vector<1x1x1xf32>
    %106 = vector.broadcast %103 : vector<1x1x64xf32> to vector<1x64x64xf32>
    %107 = arith.addf %101, %106 : vector<1x64x64xf32>
    %108 = vector.shape_cast %105 : vector<1x1x1xi1> to vector<1x1x1xi1>
    %109 = vector.broadcast %108 : vector<1x1x1xi1> to vector<1x64x64xi1>
    %110 = vector.shape_cast %5 : vector<64x64xf32> to vector<1x64x64xf32>
    %111 = arith.select %109, %107, %110 : vector<1x64x64xi1>, vector<1x64x64xf32>
    %112 = vector.broadcast %94 : vector<1x64x1xf32> to vector<1x64x64xf32>
    %113 = arith.addf %111, %112 : vector<1x64x64xf32>
    %cst_83 = arith.constant dense<0xFF800000> : vector<1x64xf32>
    %114 = vector.multi_reduction <maximumf>, %113, %cst_83 [1] : vector<1x64x64xf32> to vector<1x64xf32>
    %115 = vector.shape_cast %114 : vector<1x64xf32> to vector<1x1x64xf32>
    %116 = vector.broadcast %115 : vector<1x1x64xf32> to vector<1x64x64xf32>
    %117 = arith.subf %113, %116 : vector<1x64x64xf32>
    %118 = math.exp %117 : vector<1x64x64xf32>
    %cst_84 = arith.constant dense<0.000000e+00> : vector<1x64xf32>
    %119 = vector.multi_reduction <add>, %118, %cst_84 [1] : vector<1x64x64xf32> to vector<1x64xf32>
    %120 = vector.shape_cast %119 : vector<1x64xf32> to vector<1x1x64xf32>
    %121 = math.log %120 : vector<1x1x64xf32>
    %122 = arith.addf %115, %121 : vector<1x1x64xf32>
    %c0_85 = arith.constant 0 : index
    %c0_86 = arith.constant 0 : index
    %c4 = arith.constant 4 : index
    %c0_87 = arith.constant 0 : index
    %c0_88 = arith.constant 0 : index
    %123 = vector.load %arg3[%c0_85, %c0_86, %c4, %c0_87, %c0_88] : memref<1x1x8x64x32xbf16, #tpu.memory_space<vmem>>, vector<1x1x1x64x32xbf16>
    %124 = vector.shape_cast %123 : vector<1x1x1x64x32xbf16> to vector<1x64x32xbf16>
    %c0_89 = arith.constant 0 : index
    %c0_90 = arith.constant 0 : index
    %c4_91 = arith.constant 4 : index
    %c0_92 = arith.constant 0 : index
    %c0_93 = arith.constant 0 : index
    %125 = vector.load %arg4[%c0_89, %c0_90, %c4_91, %c0_92, %c0_93] : memref<1x1x8x64x32xbf16, #tpu.memory_space<vmem>>, vector<1x1x1x64x32xbf16>
    %126 = vector.shape_cast %125 : vector<1x1x1x64x32xbf16> to vector<1x64x32xbf16>
    %c0_94 = arith.constant 0 : index
    %c0_95 = arith.constant 0 : index
    %c4_96 = arith.constant 4 : index
    %c0_97 = arith.constant 0 : index
    %127 = vector.load %arg6[%c0_94, %c0_95, %c4_96, %c0_97] : memref<1x1x8x1xf32, #tpu.memory_space<vmem>>, vector<1x1x1x1xf32>
    %128 = vector.shape_cast %127 : vector<1x1x1x1xf32> to vector<1x1x1xf32>
    "tpu.trace_start"() <{level = 10 : i32, message = "bkr,bjr->bkj"}> : () -> ()
    %cst_98 = arith.constant dense<0.000000e+00> : vector<1x64x64xf32>
    %129 = tpu.matmul %126, %124, %cst_98 {dimension_numbers = #tpu.dot_dimension_numbers<[2], [2], [1], [1], [0, 0, 0, 1, 1, 1], [0], [0]>} : vector<1x64x32xbf16>, vector<1x64x32xbf16>, vector<1x64x64xf32> -> vector<1x64x64xf32>
    "tpu.trace_stop"() : () -> ()
    %130 = vector.extract_strided_slice %11 {offsets = [0, 0, 4], sizes = [1, 64, 1], strides = [1, 1, 1]} : vector<1x64x8xf32> to vector<1x64x1xf32>
    %cst_99 = arith.constant 5.000000e-01 : f32
    %131 = vector.broadcast %cst_99 : f32 to vector<1x1x1xf32>
    %132 = arith.cmpf ogt, %128, %131 : vector<1x1x1xf32>
    %133 = vector.broadcast %130 : vector<1x64x1xf32> to vector<1x64x64xf32>
    %134 = arith.addf %129, %133 : vector<1x64x64xf32>
    %135 = vector.shape_cast %132 : vector<1x1x1xi1> to vector<1x1x1xi1>
    %136 = vector.broadcast %135 : vector<1x1x1xi1> to vector<1x64x64xi1>
    %137 = vector.shape_cast %5 : vector<64x64xf32> to vector<1x64x64xf32>
    %138 = arith.select %136, %134, %137 : vector<1x64x64xi1>, vector<1x64x64xf32>
    %139 = vector.broadcast %122 : vector<1x1x64xf32> to vector<1x64x64xf32>
    %140 = arith.addf %138, %139 : vector<1x64x64xf32>
    %cst_100 = arith.constant dense<0xFF800000> : vector<1x64xf32>
    %141 = vector.multi_reduction <maximumf>, %140, %cst_100 [2] : vector<1x64x64xf32> to vector<1x64xf32>
    %142 = vector.shape_cast %141 : vector<1x64xf32> to vector<1x64x1xf32>
    %143 = vector.broadcast %142 : vector<1x64x1xf32> to vector<1x64x64xf32>
    %144 = arith.subf %140, %143 : vector<1x64x64xf32>
    %145 = math.exp %144 : vector<1x64x64xf32>
    %cst_101 = arith.constant dense<0.000000e+00> : vector<1x64xf32>
    %146 = vector.multi_reduction <add>, %145, %cst_101 [2] : vector<1x64x64xf32> to vector<1x64xf32>
    %147 = vector.shape_cast %146 : vector<1x64xf32> to vector<1x64x1xf32>
    %148 = math.log %147 : vector<1x64x1xf32>
    %149 = arith.addf %142, %148 : vector<1x64x1xf32>
    %c0_102 = arith.constant 0 : index
    %c0_103 = arith.constant 0 : index
    %c5 = arith.constant 5 : index
    %c0_104 = arith.constant 0 : index
    %c0_105 = arith.constant 0 : index
    %150 = vector.load %arg3[%c0_102, %c0_103, %c5, %c0_104, %c0_105] : memref<1x1x8x64x32xbf16, #tpu.memory_space<vmem>>, vector<1x1x1x64x32xbf16>
    %151 = vector.shape_cast %150 : vector<1x1x1x64x32xbf16> to vector<1x64x32xbf16>
    %c0_106 = arith.constant 0 : index
    %c0_107 = arith.constant 0 : index
    %c5_108 = arith.constant 5 : index
    %c0_109 = arith.constant 0 : index
    %c0_110 = arith.constant 0 : index
    %152 = vector.load %arg4[%c0_106, %c0_107, %c5_108, %c0_109, %c0_110] : memref<1x1x8x64x32xbf16, #tpu.memory_space<vmem>>, vector<1x1x1x64x32xbf16>
    %153 = vector.shape_cast %152 : vector<1x1x1x64x32xbf16> to vector<1x64x32xbf16>
    %c0_111 = arith.constant 0 : index
    %c0_112 = arith.constant 0 : index
    %c5_113 = arith.constant 5 : index
    %c0_114 = arith.constant 0 : index
    %154 = vector.load %arg6[%c0_111, %c0_112, %c5_113, %c0_114] : memref<1x1x8x1xf32, #tpu.memory_space<vmem>>, vector<1x1x1x1xf32>
    %155 = vector.shape_cast %154 : vector<1x1x1x1xf32> to vector<1x1x1xf32>
    "tpu.trace_start"() <{level = 10 : i32, message = "bjr,bkr->bjk"}> : () -> ()
    %cst_115 = arith.constant dense<0.000000e+00> : vector<1x64x64xf32>
    %156 = tpu.matmul %151, %153, %cst_115 {dimension_numbers = #tpu.dot_dimension_numbers<[2], [2], [1], [1], [0, 0, 0, 1, 1, 1], [0], [0]>} : vector<1x64x32xbf16>, vector<1x64x32xbf16>, vector<1x64x64xf32> -> vector<1x64x64xf32>
    "tpu.trace_stop"() : () -> ()
    %c0_116 = arith.constant 0 : index
    %c0_117 = arith.constant 0 : index
    %c5_118 = arith.constant 5 : index
    %c0_119 = arith.constant 0 : index
    %157 = vector.load %arg5[%c0_116, %c0_117, %c5_118, %c0_119] : memref<1x1x8x64xf32, #tpu.memory_space<vmem>>, vector<1x1x1x64xf32>
    %158 = vector.shape_cast %157 : vector<1x1x1x64xf32> to vector<1x1x64xf32>
    %cst_120 = arith.constant 5.000000e-01 : f32
    %159 = vector.broadcast %cst_120 : f32 to vector<1x1x1xf32>
    %160 = arith.cmpf ogt, %155, %159 : vector<1x1x1xf32>
    %161 = vector.broadcast %158 : vector<1x1x64xf32> to vector<1x64x64xf32>
    %162 = arith.addf %156, %161 : vector<1x64x64xf32>
    %163 = vector.shape_cast %160 : vector<1x1x1xi1> to vector<1x1x1xi1>
    %164 = vector.broadcast %163 : vector<1x1x1xi1> to vector<1x64x64xi1>
    %165 = vector.shape_cast %5 : vector<64x64xf32> to vector<1x64x64xf32>
    %166 = arith.select %164, %162, %165 : vector<1x64x64xi1>, vector<1x64x64xf32>
    %167 = vector.broadcast %149 : vector<1x64x1xf32> to vector<1x64x64xf32>
    %168 = arith.addf %166, %167 : vector<1x64x64xf32>
    %cst_121 = arith.constant dense<0xFF800000> : vector<1x64xf32>
    %169 = vector.multi_reduction <maximumf>, %168, %cst_121 [1] : vector<1x64x64xf32> to vector<1x64xf32>
    %170 = vector.shape_cast %169 : vector<1x64xf32> to vector<1x1x64xf32>
    %171 = vector.broadcast %170 : vector<1x1x64xf32> to vector<1x64x64xf32>
    %172 = arith.subf %168, %171 : vector<1x64x64xf32>
    %173 = math.exp %172 : vector<1x64x64xf32>
    %cst_122 = arith.constant dense<0.000000e+00> : vector<1x64xf32>
    %174 = vector.multi_reduction <add>, %173, %cst_122 [1] : vector<1x64x64xf32> to vector<1x64xf32>
    %175 = vector.shape_cast %174 : vector<1x64xf32> to vector<1x1x64xf32>
    %176 = math.log %175 : vector<1x1x64xf32>
    %177 = arith.addf %170, %176 : vector<1x1x64xf32>
    %c0_123 = arith.constant 0 : index
    %c0_124 = arith.constant 0 : index
    %c6 = arith.constant 6 : index
    %c0_125 = arith.constant 0 : index
    %c0_126 = arith.constant 0 : index
    %178 = vector.load %arg3[%c0_123, %c0_124, %c6, %c0_125, %c0_126] : memref<1x1x8x64x32xbf16, #tpu.memory_space<vmem>>, vector<1x1x1x64x32xbf16>
    %179 = vector.shape_cast %178 : vector<1x1x1x64x32xbf16> to vector<1x64x32xbf16>
    %c0_127 = arith.constant 0 : index
    %c0_128 = arith.constant 0 : index
    %c6_129 = arith.constant 6 : index
    %c0_130 = arith.constant 0 : index
    %c0_131 = arith.constant 0 : index
    %180 = vector.load %arg4[%c0_127, %c0_128, %c6_129, %c0_130, %c0_131] : memref<1x1x8x64x32xbf16, #tpu.memory_space<vmem>>, vector<1x1x1x64x32xbf16>
    %181 = vector.shape_cast %180 : vector<1x1x1x64x32xbf16> to vector<1x64x32xbf16>
    %c0_132 = arith.constant 0 : index
    %c0_133 = arith.constant 0 : index
    %c6_134 = arith.constant 6 : index
    %c0_135 = arith.constant 0 : index
    %182 = vector.load %arg6[%c0_132, %c0_133, %c6_134, %c0_135] : memref<1x1x8x1xf32, #tpu.memory_space<vmem>>, vector<1x1x1x1xf32>
    %183 = vector.shape_cast %182 : vector<1x1x1x1xf32> to vector<1x1x1xf32>
    "tpu.trace_start"() <{level = 10 : i32, message = "bkr,bjr->bkj"}> : () -> ()
    %cst_136 = arith.constant dense<0.000000e+00> : vector<1x64x64xf32>
    %184 = tpu.matmul %181, %179, %cst_136 {dimension_numbers = #tpu.dot_dimension_numbers<[2], [2], [1], [1], [0, 0, 0, 1, 1, 1], [0], [0]>} : vector<1x64x32xbf16>, vector<1x64x32xbf16>, vector<1x64x64xf32> -> vector<1x64x64xf32>
    "tpu.trace_stop"() : () -> ()
    %185 = vector.extract_strided_slice %11 {offsets = [0, 0, 6], sizes = [1, 64, 1], strides = [1, 1, 1]} : vector<1x64x8xf32> to vector<1x64x1xf32>
    %cst_137 = arith.constant 5.000000e-01 : f32
    %186 = vector.broadcast %cst_137 : f32 to vector<1x1x1xf32>
    %187 = arith.cmpf ogt, %183, %186 : vector<1x1x1xf32>
    %188 = vector.broadcast %185 : vector<1x64x1xf32> to vector<1x64x64xf32>
    %189 = arith.addf %184, %188 : vector<1x64x64xf32>
    %190 = vector.shape_cast %187 : vector<1x1x1xi1> to vector<1x1x1xi1>
    %191 = vector.broadcast %190 : vector<1x1x1xi1> to vector<1x64x64xi1>
    %192 = vector.shape_cast %5 : vector<64x64xf32> to vector<1x64x64xf32>
    %193 = arith.select %191, %189, %192 : vector<1x64x64xi1>, vector<1x64x64xf32>
    %194 = vector.broadcast %177 : vector<1x1x64xf32> to vector<1x64x64xf32>
    %195 = arith.addf %193, %194 : vector<1x64x64xf32>
    %cst_138 = arith.constant dense<0xFF800000> : vector<1x64xf32>
    %196 = vector.multi_reduction <maximumf>, %195, %cst_138 [2] : vector<1x64x64xf32> to vector<1x64xf32>
    %197 = vector.shape_cast %196 : vector<1x64xf32> to vector<1x64x1xf32>
    %198 = vector.broadcast %197 : vector<1x64x1xf32> to vector<1x64x64xf32>
    %199 = arith.subf %195, %198 : vector<1x64x64xf32>
    %200 = math.exp %199 : vector<1x64x64xf32>
    %cst_139 = arith.constant dense<0.000000e+00> : vector<1x64xf32>
    %201 = vector.multi_reduction <add>, %200, %cst_139 [2] : vector<1x64x64xf32> to vector<1x64xf32>
    %202 = vector.shape_cast %201 : vector<1x64xf32> to vector<1x64x1xf32>
    %203 = math.log %202 : vector<1x64x1xf32>
    %204 = arith.addf %197, %203 : vector<1x64x1xf32>
    %c0_140 = arith.constant 0 : index
    %c0_141 = arith.constant 0 : index
    %c7 = arith.constant 7 : index
    %c0_142 = arith.constant 0 : index
    %c0_143 = arith.constant 0 : index
    %205 = vector.load %arg3[%c0_140, %c0_141, %c7, %c0_142, %c0_143] : memref<1x1x8x64x32xbf16, #tpu.memory_space<vmem>>, vector<1x1x1x64x32xbf16>
    %206 = vector.shape_cast %205 : vector<1x1x1x64x32xbf16> to vector<1x64x32xbf16>
    %c0_144 = arith.constant 0 : index
    %c0_145 = arith.constant 0 : index
    %c7_146 = arith.constant 7 : index
    %c0_147 = arith.constant 0 : index
    %c0_148 = arith.constant 0 : index
    %207 = vector.load %arg4[%c0_144, %c0_145, %c7_146, %c0_147, %c0_148] : memref<1x1x8x64x32xbf16, #tpu.memory_space<vmem>>, vector<1x1x1x64x32xbf16>
    %208 = vector.shape_cast %207 : vector<1x1x1x64x32xbf16> to vector<1x64x32xbf16>
    %c0_149 = arith.constant 0 : index
    %c0_150 = arith.constant 0 : index
    %c7_151 = arith.constant 7 : index
    %c0_152 = arith.constant 0 : index
    %209 = vector.load %arg6[%c0_149, %c0_150, %c7_151, %c0_152] : memref<1x1x8x1xf32, #tpu.memory_space<vmem>>, vector<1x1x1x1xf32>
    %210 = vector.shape_cast %209 : vector<1x1x1x1xf32> to vector<1x1x1xf32>
    "tpu.trace_start"() <{level = 10 : i32, message = "bjr,bkr->bjk"}> : () -> ()
    %cst_153 = arith.constant dense<0.000000e+00> : vector<1x64x64xf32>
    %211 = tpu.matmul %206, %208, %cst_153 {dimension_numbers = #tpu.dot_dimension_numbers<[2], [2], [1], [1], [0, 0, 0, 1, 1, 1], [0], [0]>} : vector<1x64x32xbf16>, vector<1x64x32xbf16>, vector<1x64x64xf32> -> vector<1x64x64xf32>
    "tpu.trace_stop"() : () -> ()
    %c0_154 = arith.constant 0 : index
    %c0_155 = arith.constant 0 : index
    %c7_156 = arith.constant 7 : index
    %c0_157 = arith.constant 0 : index
    %212 = vector.load %arg5[%c0_154, %c0_155, %c7_156, %c0_157] : memref<1x1x8x64xf32, #tpu.memory_space<vmem>>, vector<1x1x1x64xf32>
    %213 = vector.shape_cast %212 : vector<1x1x1x64xf32> to vector<1x1x64xf32>
    %cst_158 = arith.constant 5.000000e-01 : f32
    %214 = vector.broadcast %cst_158 : f32 to vector<1x1x1xf32>
    %215 = arith.cmpf ogt, %210, %214 : vector<1x1x1xf32>
    %216 = vector.broadcast %213 : vector<1x1x64xf32> to vector<1x64x64xf32>
    %217 = arith.addf %211, %216 : vector<1x64x64xf32>
    %218 = vector.shape_cast %215 : vector<1x1x1xi1> to vector<1x1x1xi1>
    %219 = vector.broadcast %218 : vector<1x1x1xi1> to vector<1x64x64xi1>
    %220 = vector.shape_cast %5 : vector<64x64xf32> to vector<1x64x64xf32>
    %221 = arith.select %219, %217, %220 : vector<1x64x64xi1>, vector<1x64x64xf32>
    %222 = vector.broadcast %204 : vector<1x64x1xf32> to vector<1x64x64xf32>
    %223 = arith.addf %221, %222 : vector<1x64x64xf32>
    %cst_159 = arith.constant dense<0xFF800000> : vector<1x64xf32>
    %224 = vector.multi_reduction <maximumf>, %223, %cst_159 [1] : vector<1x64x64xf32> to vector<1x64xf32>
    %225 = vector.shape_cast %224 : vector<1x64xf32> to vector<1x1x64xf32>
    %226 = vector.broadcast %225 : vector<1x1x64xf32> to vector<1x64x64xf32>
    %227 = arith.subf %223, %226 : vector<1x64x64xf32>
    %228 = math.exp %227 : vector<1x64x64xf32>
    %cst_160 = arith.constant dense<0.000000e+00> : vector<1x64xf32>
    %229 = vector.multi_reduction <add>, %228, %cst_160 [1] : vector<1x64x64xf32> to vector<1x64xf32>
    %230 = vector.shape_cast %229 : vector<1x64xf32> to vector<1x1x64xf32>
    %231 = math.log %230 : vector<1x1x64xf32>
    %232 = arith.addf %225, %231 : vector<1x1x64xf32>
    %c0_161 = arith.constant 0 : index
    %c0_162 = arith.constant 0 : index
    %c0_163 = arith.constant 0 : index
    %233 = vector.load %arg8[%c0_161, %c0_162, %c0_163] : memref<1x1x64xf32, #tpu.memory_space<vmem>>, vector<1x1x64xf32>
    tpu.vector_store %arg8[%c0_161, %c0_162, %c0_163], %232 {strides = array<i32>} : memref<1x1x64xf32, #tpu.memory_space<vmem>>, vector<1x1x64xf32>,
    %c0_i32_164 = arith.constant 0 : i32
    %234 = arith.cmpi eq, %arg1, %c0_i32_164 : i32
    %235 = arith.extui %234 : i1 to i32
    %c0_i32_165 = arith.constant 0 : i32
    %236 = arith.cmpi ne, %235, %c0_i32_165 : i32
    scf.if %236 {
      %cst_166 = arith.constant dense<0xFF800000> : vector<1x1xf32>
      %237 = vector.multi_reduction <maximumf>, %232, %cst_166 [2] : vector<1x1x64xf32> to vector<1x1xf32>
      %238 = vector.shape_cast %237 : vector<1x1xf32> to vector<1x1x1xf32>
      %239 = vector.broadcast %238 : vector<1x1x1xf32> to vector<1x1x64xf32>
      %240 = arith.subf %232, %239 : vector<1x1x64xf32>
      %241 = math.exp %240 : vector<1x1x64xf32>
      %cst_167 = arith.constant dense<0.000000e+00> : vector<1x1xf32>
      %242 = vector.multi_reduction <add>, %241, %cst_167 [2] : vector<1x1x64xf32> to vector<1x1xf32>
      %243 = vector.shape_cast %242 : vector<1x1xf32> to vector<1x1x1xf32>
      %244 = math.log %243 : vector<1x1x1xf32>
      %245 = arith.addf %238, %244 : vector<1x1x1xf32>
      %c0_168 = arith.constant 0 : index
      %c0_169 = arith.constant 0 : index
      %c0_170 = arith.constant 0 : index
      %c0_171 = arith.constant 0 : index
      %246 = vector.load %arg7[%c0_168, %c0_169, %c0_170, %c0_171] : memref<1x1x1x1xf32, #tpu.memory_space<vmem>>, vector<1x1x1x1xf32>
      %247 = vector.shape_cast %246 : vector<1x1x1x1xf32> to vector<1x1x1xf32>
      %248 = vector.shape_cast %245 : vector<1x1x1xf32> to vector<1x1x1x1xf32>
      tpu.vector_store %arg7[%c0_168, %c0_169, %c0_170, %c0_171], %248 {strides = array<i32>} : memref<1x1x1x1xf32, #tpu.memory_space<vmem>>, vector<1x1x1x1xf32>,
    } else {
    }
    return
  }
  func.func @transform_0(%arg0: i32, %arg1: i32) -> (i32, i32, i32, i32) {
    %c0_i32 = arith.constant 0 : i32
    %c0_i32_0 = arith.constant 0 : i32
    %c0_i32_1 = arith.constant 0 : i32
    %c0_i32_2 = arith.constant 0 : i32
    return %arg0, %c0_i32, %c0_i32_0, %c0_i32_1 : i32, i32, i32, i32
  }
  func.func @transform_1(%arg0: i32, %arg1: i32) -> (i32, i32, i32, i32, i32) {
    %c0_i32 = arith.constant 0 : i32
    %c0_i32_0 = arith.constant 0 : i32
    %c0_i32_1 = arith.constant 0 : i32
    %c0_i32_2 = arith.constant 0 : i32
    return %arg0, %c0_i32, %arg1, %c0_i32_0, %c0_i32_1 : i32, i32, i32, i32, i32
  }
  func.func @transform_2(%arg0: i32, %arg1: i32) -> (i32, i32, i32, i32, i32) {
    %c0_i32 = arith.constant 0 : i32
    %c0_i32_0 = arith.constant 0 : i32
    %c0_i32_1 = arith.constant 0 : i32
    %c0_i32_2 = arith.constant 0 : i32
    return %arg0, %c0_i32, %arg1, %c0_i32_0, %c0_i32_1 : i32, i32, i32, i32, i32
  }
  func.func @transform_3(%arg0: i32, %arg1: i32) -> (i32, i32, i32, i32) {
    %c0_i32 = arith.constant 0 : i32
    %c0_i32_0 = arith.constant 0 : i32
    %c0_i32_1 = arith.constant 0 : i32
    return %arg0, %c0_i32, %arg1, %c0_i32_0 : i32, i32, i32, i32
  }
  func.func @transform_4(%arg0: i32, %arg1: i32) -> (i32, i32, i32, i32) {
    %c0_i32 = arith.constant 0 : i32
    %c0_i32_0 = arith.constant 0 : i32
    %c0_i32_1 = arith.constant 0 : i32
    return %arg0, %c0_i32, %arg1, %c0_i32_0 : i32, i32, i32, i32
  }
  func.func @transform_5(%arg0: i32, %arg1: i32) -> (i32, i32, i32, i32) {
    %c0_i32 = arith.constant 0 : i32
    %c0_i32_0 = arith.constant 0 : i32
    %c0_i32_1 = arith.constant 0 : i32
    %c0_i32_2 = arith.constant 0 : i32
    return %arg0, %c0_i32, %c0_i32_0, %c0_i32_1 : i32, i32, i32, i32
  }
}

</mosaic_0001>

<bundles_post_ra>
// kernel: sub.1
= control target key start
LH: loop header
LB: loop body
LE: loop exit
PB: predicated region body
PF: predicated region fallthrough
CT: control target
= control target key end

     0   :  { %3 = vsyncpa [#allocation1], 0  ;;  %s80_s0 = inlined_call_operand.vmem [shape: f32[2], index: 0, kind: input, shape index: {}]   ;;  %s81_s1 = inlined_call_operand.vmem [shape: f32[2], index: 1, kind: input, shape index: {}]   ;;  %s82_s2 = inlined_call_operand.hbm [shape: f32[2], index: 2, kind: output, shape index: {}]  }
   0x1   :  { %v4_v0 = vld [vmem:[%s80_s0] sm:$0x1] }
   0x2   :  { %v5_v1 = vld [vmem:[%s81_s1] sm:$0x1]  ;;  %s46_s1 = smov [#allocation0]  }
   0x3   :  { %v8_v2 = vsub.f32 %v4_v0, %v5_v1  ;;  %s15_s12 = sshll.u32 %s46_s1, 4  ;;  %s16_s12 = int_to_ptr.vmem [resolvable:$true] %s15_s12 }
   0x4   :  { %s22_s13 = scalar_lea.vmem %s16_s12, 16  ;;  %s26_s14 = scalar_lea.vmem %s16_s12, 32 }
   0x5   :  { %10 = vst [vmem:[#allocation0] sm:$0x1] %v8_v2  ;;  %p23_p0 = scmp.ne.s32.totalorder %s16_s12, %s22_s13  ;;  %p27_p1 = scmp.lt.s32.totalorder %s16_s12, %s16_s12 }
   0x6   :  { %p28_p2 = scmp.lt.s32.totalorder %s26_s14, %s22_s13 }
   0x8   :  { %p29_p3 = por %p28_p2, %p27_p1 }
   0xa   :  { %p30_p4 = pnand %p29_p3, %p23_p0 }
   0xc   :  { %33 = shalt.err (!%p30_p4)
}
   0xd   :  { %s34_s17 = scalar_lea.hbm %s82_s2, 16 }
   0xe   :  { %p35_p5 = scmp.ne.s32.totalorder %s82_s2, %s34_s17  ;;  %p38_p6 = scmp.lt.u32.totalorder %s34_s17, %s82_s2 }
  0x10   :  { %p40_p7 = pnand %p38_p6, %p35_p5 }
  0x12   :  { %43 = shalt.err (!%p40_p7)
}
  0x13   :  { %18 = dma.vmem_to_hbm [thread:$0]  %s16_s12, 16, %s82_s2, [#allocation1]  }
  0x14   :  { %44 = dma.done.wait [#allocation1], 16  }
  0x15   :  { %45 = vsyncadd [#allocation1], 4294967280 }
  0x16   :  { %20 = vsyncpa [#allocation1], 1 }

// kernel: crf_forward.1
= control target key start
LH: loop header
LB: loop body
LE: loop exit
PB: predicated region body
PF: predicated region fallthrough
CT: control target
= control target key end

     0   :  { %s3580_s18 = smov 0   ;;  %s3582_s19 = smov 0   ;;  %s4611_s0 = inlined_call_operand.vmem [shape: f32[2,1,1,64], index: 0, kind: input, shape index: {}]   ;;  %s4612_s1 = inlined_call_operand.vmem [shape: bf16[2,1,8,64,32], index: 1, kind: input, shape index: {}]   ;;  %s4613_s2 = inlined_call_operand.vmem [shape: bf16[2,1,8,64,32], index: 2, kind: input, shape index: {}]   ;;  %s4614_s3 = inlined_call_operand.vmem [shape: f32[2,1,8,64], index: 3, kind: input, shape index: {}]   ;;  %s4615_s4 = inlined_call_operand.vmem [shape: f32[2,1,8,1], index: 4, kind: input, shape index: {}]   ;;  %s4616_s5 = inlined_call_operand.vmem [shape: f32[2,1,1,1], index: 5, kind: output, shape index: {}]  }
   0x1   :  { %s3584_s20 = smov 0  }
   0x2 LB: > { %s27_s21 = sadd.s32 1, %s3539_s19  ;;  %p2751_p0 = scmp.ge.s32.totalorder %s3543_s20, 1  ;;  %s3543_s20 = sphi %s3584_s20, %s15_s20   ;;  %s3539_s19 = sphi %s3582_s19, %s4634_s19   ;;  %s3535_s18 = sphi %s3580_s18, %s4633_s18  }
   0x3   : > { %p29_p1 = scmp.ge.s32.totalorder %s27_s21, 2  ;;  %p261_p2 = scmp.lt.s32.totalorder %s3543_s20, 3 }
   0x5   : > { %s4636_s21 = smov (%p29_p1, %s27_s21), 0  ;;  %p262_p3 = pnand %p2751_p0, %p261_p2 }
   0x6   : > { %p319_p4 = scmp.lt.s32.totalorder (!%p262_p3), %s3535_s18, 1  ;;  %v3545_v0 = vmov (!%p262_p3), 0   ;;  %vm394_vm0 = vcmask (!%p262_p3), 516096   ;;  %vm528_vm1 = vcmask (!%p262_p3), 261120   ;;  %v362_v53 = vlaneseq (!%p262_p3) }
   0x7   : > { %265 = sbr.rel (%p262_p3) target bundleno = 2258 (0x8d2), region = 40  ;;  %3246 = vset.pattern.permute.xlu1 (!%p262_p3), %v3545_v0  ;;  %vm644_vm7 = vcmask (!%p262_p3), 523264  }
   0x8   : > { %v363_v55 = vshrl.u32 (!%p262_p3), %v362_v53, 7  ;;  %v3720_v59 = vand.u32 (!%p262_p3), 127, %v362_v53 }
   0xa   : > { %v365_v58 = vadd.s32 (!%p262_p3), 16, %v363_v55  ;;  %vm373_vm4 = vcmp.eq.s32.totalorder (!%p262_p3), %v363_v55, %v3720_v59 }
   0xc   : > { %vm375_vm3 = vcmp.eq.s32.totalorder (!%p262_p3), %v365_v58, %v3720_v59 }
   0xe   : > { %s4638_s18 = smov (!%p319_p4, %s3535_s18), 1 }
   0xf   : > { %s2756_s22 = sshll.u32 %s4638_s18, 3  ;;  %s321_s25 = scalar_lea.vmem %s4611_s0, %s4638_s18 }
  0x10   : > { %s3609_s28 = scalar_lea.vmem %s4614_s3, %s2756_s22  ;;  %v393_v1 = vld [vmem:[%s321_s25] sm:$0x1]  ;;  %s2973_s29 = sshll.u32 %s4638_s18, 8 }
  0x11   : > { %v396_v2 = vld [vmem:[%s3609_s28] sm:$0xff]  ;;  %395 = vst.msk [vmem:[#allocation2] sm:$0x1] %vm394_vm0, %v393_v1  ;;  %s3617_s7 = scalar_lea.vmem %s4612_s1, %s2973_s29  ;;  %s3623_s10 = scalar_lea.vmem %s4613_s2, %s2973_s29  ;;  %v366_v1 = vadd.s32 24, %v363_v55 }
  0x12   : > { %397 = vxpose.xlu0.b32.start.end [1/1] (short) (narrow) %v396_v2, 64  ;;  %v3253_v3 = vld [vmem:[%s3617_s7] sm:$0xff]   ;;  %v3254_v4 = vld [vmem:[%s3617_s7 + $0x8] sm:$0xff]   ;;  %v3255_v6 = vld [vmem:[%s3617_s7 + $0x10] sm:$0xff]   ;;  %s3641_s13 = scalar_lea.vmem %s4615_s4, %s2756_s22 }
  0x13   : > { %3167 = vmatprep.subr.msk.bf16.mxu0 %vm528_vm1, %v3253_v3  ;;  %v542_v5 = vsel %vm528_vm1, %v3253_v3, 0  ;;  %v3256_v7 = vld [vmem:[%s3617_s7 + $0x18] sm:$0xff]   ;;  %v3257_v8 = vld [vmem:[%s3623_s10] sm:$0xff]   ;;  %v545_v9 = vsel %vm528_vm1, %v3254_v4, 0  ;;  %v548_v10 = vsel %vm528_vm1, %v3255_v6, 0  ;;  %v3258_v13 = vld [vmem:[%s3623_s10 + $0x8] sm:$0xff]   ;;  %vm376_vm6 = vcmp.eq.s32.totalorder %v366_v1, %v3720_v59 }
  0x14   : > { %3040 = vmatpush3.bf16.xpose.msra.mxu0 %v542_v5  ;;  %3047 = vmatprep.mubr.msk.bf16.mxu0 %vm528_vm1, %v3257_v8  ;;  %v551_v11 = vsel %vm528_vm1, %v3256_v7, 0  ;;  %v446_v12 = vld [vmem:[%s3641_s13] sm:$0x1]  ;;  %v3259_v14 = vld [vmem:[%s3623_s10 + $0x10] sm:$0xff]   ;;  %v3260_v16 = vld [vmem:[%s3623_s10 + $0x18] sm:$0xff]  }
  0x15   : > { %3168 = vmatprep.subr.msk.bf16.mxu0 %vm528_vm1, %v3254_v4  ;;  %vm447_vm2 = vcmp.gt.f32.partialorder %v446_v12, 0.5  ;;  %v3261_v25 = vld [vmem:[%s3623_s10 + $0x20] sm:$0xff]   ;;  %v3262_v26 = vld [vmem:[%s3623_s10 + $0x28] sm:$0xff]   ;;  %v3264_v34 = vld [vmem:[%s3623_s10 + $0x30] sm:$0xff]   ;;  %v3546_v5 = vmov -1e+30  }
  0x16   : > { %v618_v15 = vsel %vm447_vm2, 1, %v3545_v0  ;;  %v3263_v27 = vld [vmem:[%s3617_s7 + $0x40] sm:$0xff]   ;;  %v3265_v28 = vld [vmem:[%s3617_s7 + $0x48] sm:$0xff]   ;;  %3171 = vmatprep.subr.msk.bf16.mxu1 %vm528_vm1, %v3261_v25  ;;  %v819_v29 = vsel %vm528_vm1, %v3261_v25, 0  ;;  %v822_v33 = vsel %vm528_vm1, %v3262_v26, 0  ;;  %v3267_v36 = vld [vmem:[%s3617_s7 + $0x50] sm:$0xff]  }
  0x17   : > { %3199 = vpush %v618_v15  ;;  %v1089_v30 = vsel %vm528_vm1, %v3263_v27, 0  ;;  %v3268_v31 = vld [vmem:[%s3617_s7 + $0x20] sm:$0xff]   ;;  %3056 = vmatpush3.bf16.xpose.msra.mxu1 %v819_v29  ;;  %v1092_v35 = vsel %vm528_vm1, %v3265_v28, 0  ;;  %v825_v37 = vsel %vm528_vm1, %v3264_v34, 0  ;;  %v3266_v38 = vld [vmem:[%s3623_s10 + $0x38] sm:$0xff]   ;;  %v1095_v39 = vsel %vm528_vm1, %v3267_v36, 0 }
  0x18   : > { %3172 = vmatprep.subr.msk.bf16.mxu1 %vm528_vm1, %v3262_v26  ;;  %v3273_v32 = vld [vmem:[%s3623_s10 + $0x40] sm:$0xff]   ;;  %3063 = vmatprep.mubr.msk.bf16.mxu1 %vm528_vm1, %v3268_v31  ;;  %v3270_v40 = vld [vmem:[%s3617_s7 + $0x58] sm:$0xff]   ;;  %v828_v41 = vsel %vm528_vm1, %v3266_v38, 0  ;;  %v3269_v43 = vld [vmem:[%s3617_s7 + $0x28] sm:$0xff]  }
  0x19   : > { %v1098_v42 = vsel %vm528_vm1, %v3270_v40, 0  ;;  %v3274_v44 = vld [vmem:[%s3623_s10 + $0x48] sm:$0xff]   ;;  %v3271_v45 = vld [vmem:[%s3617_s7 + $0x30] sm:$0xff]   ;;  %v3272_v47 = vld [vmem:[%s3617_s7 + $0x38] sm:$0xff]  }
  0x1a   : > { %v3275_v46 = vld [vmem:[%s3623_s10 + $0x50] sm:$0xff]   ;;  %v3276_v48 = vld [vmem:[%s3623_s10 + $0x58] sm:$0xff]  }
  0x1c   : > { %3042 = vmatpush3.bf16.xpose.msra.mxu0 %v545_v9  ;;  %v367_v9 = vadd.s32 32, %v363_v55 }
  0x1d   : > { %3169 = vmatprep.subr.msk.bf16.mxu0 %vm528_vm1, %v3255_v6  ;;  %v3728_v6 = vsel %vm375_vm3, 0.0, %v3546_v5 }
  0x1e   : > { %vm377_vm8 = vcmp.eq.s32.totalorder %v367_v9, %v3720_v59 }
  0x1f   : > { %3058 = vmatpush3.bf16.xpose.msra.mxu1 %v822_v33  ;;  %v3752_v31 = vsel %vm377_vm8, 0.0, %v3546_v5 }
  0x20   : > { %3173 = vmatprep.subr.msk.bf16.mxu1 %vm528_vm1, %v3264_v34  ;;  %v369_v34 = vadd.s32 48, %v363_v55 }
  0x22   : > { %vm379_vm10 = vcmp.eq.s32.totalorder %v369_v34, %v3720_v59 }
  0x24   : > { %3044 = vmatpush3.bf16.xpose.msra.mxu0 %v548_v10  ;;  %v364_v10 = vadd.s32 8, %v363_v55 }
  0x25   : > { %3170 = vmatprep.subr.msk.bf16.mxu0 %vm528_vm1, %v3256_v7  ;;  %v3730_v7 = vsel %vm373_vm4, 0.0, %v3546_v5 }
  0x26   : > { %vm374_vm9 = vcmp.eq.s32.totalorder %v364_v10, %v3720_v59 }
  0x27   : > { %3060 = vmatpush3.bf16.xpose.msra.mxu1 %v825_v37 }
  0x28   : > { %3174 = vmatprep.subr.msk.bf16.mxu1 %vm528_vm1, %v3266_v38 }
  0x2c   : > { %3046 = vmatpush3.bf16.xpose.msra.mxu0 %v551_v11  ;;  %v2770_v11 = vld [vmem:[#allocation2] ss:$0 sm:$0xff] }
  0x2d   : > { %3175 = vmatprep.subr.msk.bf16.mxu0 %vm528_vm1, %v3263_v27 }
  0x2f   : > { %3062 = vmatpush3.bf16.xpose.msra.mxu1 %v828_v41 }
  0x33   : > { %3048 = vmatmul.mubr.msk.bf16.vlgmr.msra.gmra.mrb[0].mxu0 %vm528_vm1, %v3258_v13 }
  0x34   : > { %3051 = vmatprep.mubr.msk.bf16.mxu0 %vm528_vm1, %v3259_v14  ;;  %3072 = vmatpush3.bf16.xpose.msra.mxu0 %v1089_v30 }
  0x35   : > { %3176 = vmatprep.subr.msk.bf16.mxu0 %vm528_vm1, %v3265_v28 }
  0x36   : > { %3064 = vmatmul.mubr.msk.bf16.vlgmr.msra.gmra.mrb[0].mxu1 %vm528_vm1, %v3269_v43 }
  0x37   : > { %3067 = vmatprep.mubr.msk.bf16.mxu1 %vm528_vm1, %v3271_v45 }
  0x3b   : > { %3245 = vset.pattern.permute.xlu0 %v3545_v0  ;;  %3052 = vmatmul.mubr.msk.bf16.gmra.mrb[4].mxu0 %vm528_vm1, %v3260_v16  ;;  %v3741_v16 = vsel %vm376_vm6, 0.0, %v3546_v5 }
  0x3c   : > { %3079 = vmatprep.mubr.msk.bf16.mxu0 %vm528_vm1, %v3273_v32  ;;  %3074 = vmatpush3.bf16.xpose.msra.mxu0 %v1092_v35  ;;  %v3754_v32 = vsel %vm374_vm9, 0.0, %v3546_v5  ;;  %v368_v35 = vadd.s32 40, %v363_v55 }
  0x3d   : > { %3177 = vmatprep.subr.msk.bf16.mxu0 %vm528_vm1, %v3267_v36 }
  0x3e   : > { %3068 = vmatmul.mubr.msk.bf16.gmra.mrb[4].mxu1 %vm528_vm1, %v3272_v47  ;;  %vm378_vm11 = vcmp.eq.s32.totalorder %v368_v35, %v3720_v59 }
  0x44   : > { %3076 = vmatpush3.bf16.xpose.msra.mxu0 %v1095_v39 }
  0x45   : > { %3178 = vmatprep.subr.msk.bf16.mxu0 %vm528_vm1, %v3270_v40 }
  0x48   : > { %s3200_s14 = spop %3199 }
  0x49   : > { %v620_v61 = vstv %s3200_s14 }
  0x4a   : > { %vm3724_vm5 = vcmp.eq.s32.totalorder %v620_v61, 1 }
  0x4c   : > { %3078 = vmatpush3.bf16.xpose.msra.mxu0 %v1098_v42  ;;  %v370_v42 = vadd.s32 56, %v363_v55 }
  0x4e   : > { %vm380_vm12 = vcmp.eq.s32.totalorder %v370_v42, %v3720_v59 }
  0x4f   : > { %v3781_v58 = vsel %vm380_vm12, 0.0, %v3546_v5 }
  0x53   : > { %3080 = vmatmul.mubr.msk.bf16.vlgmr.msra.gmra.mrb[8].mxu0 %vm528_vm1, %v3274_v44 }
  0x54   : > { %3083 = vmatprep.mubr.msk.bf16.mxu0 %vm528_vm1, %v3275_v46 }
  0x5b   : > { %3084 = vmatmul.mubr.msk.bf16.gmra.mrb[12].mxu0 %vm528_vm1, %v3276_v48  ;;  %v3768_v48 = vsel %vm379_vm10, 0.0, %v3546_v5 }
  0x92   : > { %v3652_v17 = vpop.trf.xlu0 }
  0x93   : > { %450 = vperm.xlu0 %3245, %v3652_v17  }
  0x96   : > { %v3655_v18 = vpop.trf.xlu0 }
  0x97   : > { %455 = vperm.xlu1 %3246, %v3655_v18  }
  0x9a   : > { %v3658_v19 = vpop.trf.xlu0 }
  0x9b   : > { %460 = vperm.xlu1 %3246, %v3658_v19  }
  0x9e   : > { %v3661_v20 = vpop.trf.xlu0 }
  0x9f   : > { %465 = vperm.xlu1 %3246, %v3661_v20  }
  0xa2   : > { %v3664_v21 = vpop.trf.xlu0 }
  0xa3   : > { %470 = vperm.xlu1 %3246, %v3664_v21  }
  0xa6   : > { %v3667_v22 = vpop.trf.xlu0 }
  0xa7   : > { %475 = vperm.xlu1 %3246, %v3667_v22  }
  0xaa   : > { %v3670_v23 = vpop.trf.xlu0 }
  0xab   : > { %480 = vperm.xlu1 %3246, %v3670_v23  }
  0xae   : > { %v3673_v24 = vpop.trf.xlu0 }
  0xaf   : > { %485 = vperm.xlu1 %3246, %v3673_v24  }
 0x106   : > { %v3049_v49 = vpop.f32.mrb[0].mxu0 }
 0x107   : > { %v587_v50 = vpop.f32.mrb[1].mxu0 }
 0x108   : > { %v3050_v51 = vpop.f32.mrb[2].mxu0 }
 0x109   : > { %v590_v52 = vpop.f32.mrb[3].mxu0 }
 0x10e   : > { %v3716_v54 = vpop.f32.mrb[4].mxu0 }
 0x10f   : > { %v603_v56 = vpop.f32.mrb[5].mxu0 }
 0x110   : > { %v3718_v57 = vpop.f32.mrb[6].mxu0 }
 0x111   : > { %v606_v60 = vpop.f32.mrb[7].mxu0 }
 0x112   : > { %v451_v62 = vpop.permute.xlu0 %450 }
 0x113   : > { %v588_v2 = vadd.f32 %v587_v50, %v451_v62 }
 0x115   : > { %v622_v13 = vsel %vm3724_vm5, %v588_v2, %v3730_v7  ;;  %v3547_v2 = vmov 2  }
 0x116   : > { %v456_v63 = vpop.permute.xlu1 %455  ;;  %v3747_v27 = vadd.f32 %v2770_v11, %v622_v13  ;;  %3247 = vset.pattern.permute.xlu0 %v3547_v2  ;;  %3248 = vset.pattern.permute.xlu1 %v3547_v2 }
 0x117   : > { %v591_v28 = vadd.f32 %v590_v52, %v456_v63 }
 0x118   : > { %v645_v36 = vsel %vm644_vm7, %v3747_v27, -inf }
 0x119   : > { %v623_v39 = vsel %vm3724_vm5, %v591_v28, %v3754_v32 }
 0x11a   : > { %v461_v4 = vpop.permute.xlu1 %460  ;;  %v637_v45 = vadd.f32 %v2770_v11, %v623_v39 }
 0x11b   : > { %v596_v8 = vadd.f32 %v3049_v49, %v461_v4  ;;  %v3770_v49 = vsel %vm378_vm11, 0.0, %v3546_v5  ;;  %v759_v4 = vld [vmem:[%s3641_s13 + $0x1] sm:$0x1] }
 0x11c   : > { %vm761_vm13 = vcmp.gt.f32.partialorder %v759_v4, 0.5 }
 0x11d   : > { %v624_v12 = vsel %vm3724_vm5, %v596_v8, %v3728_v6  ;;  %v895_v5 = vsel %vm761_vm13, 1, %v3545_v0  ;;  %vm2621_vm13 = vcmask 0  }
 0x11e   : > { %v466_v14 = vpop.permute.xlu1 %465  ;;  %v3739_v15 = vadd.f32 %v2770_v11, %v624_v12  ;;  %3201 = vpush %v895_v5 }
 0x11f   : > { %v599_v25 = vadd.f32 %v3050_v51, %v466_v14  ;;  %v648_v51 = vsel %vm644_vm7, %v637_v45, -inf }
 0x120   : > { %v651_v26 = vsel %vm644_vm7, %v3739_v15, -inf }
 0x121   : > { %652 = vmax.xlane.f32.xlu1 %v651_v26  ;;  %v625_v29 = vsel %vm3724_vm5, %v599_v25, %v3741_v16 }
 0x122   : > { %v471_v30 = vpop.permute.xlu1 %470  ;;  %v639_v37 = vadd.f32 %v2770_v11, %v625_v29 }
 0x123   : > { %v604_v33 = vadd.f32 %v603_v56, %v471_v30 }
 0x124   : > { %v654_v44 = vsel %vm644_vm7, %v639_v37, -inf }
 0x125   : > { %646 = vmax.xlane.f32.xlu1 %v645_v36  ;;  %v626_v38 = vsel %vm3724_vm5, %v604_v33, %v3752_v31 }
 0x126   : > { %v476_v40 = vpop.permute.xlu1 %475  ;;  %v640_v41 = vadd.f32 %v2770_v11, %v626_v38 }
 0x127   : > { %v607_v46 = vadd.f32 %v606_v60, %v476_v40 }
 0x128   : > { %v657_v43 = vsel %vm644_vm7, %v640_v41, -inf }
 0x129   : > { %658 = vmax.xlane.f32.xlu0 %v657_v43  ;;  %655 = vmax.xlane.f32.xlu1 %v654_v44  ;;  %v627_v53 = vsel %vm3724_vm5, %v607_v46, %v3770_v49 }
 0x12a   : > { %v481_v47 = vpop.permute.xlu1 %480  ;;  %v641_v60 = vadd.f32 %v2770_v11, %v627_v53 }
 0x12b   : > { %v612_v50 = vadd.f32 %v3716_v54, %v481_v47 }
 0x12c   : > { %v660_v62 = vsel %vm644_vm7, %v641_v60, -inf }
 0x12d   : > { %649 = vmax.xlane.f32.xlu1 %v648_v51  ;;  %v628_v52 = vsel %vm3724_vm5, %v612_v50, %v3768_v48 }
 0x12e   : > { %v486_v55 = vpop.permute.xlu1 %485  ;;  %v642_v56 = vadd.f32 %v2770_v11, %v628_v52 }
 0x12f   : > { %v615_v54 = vadd.f32 %v3718_v57, %v486_v55  ;;  %v1002_v57 = vld [vmem:[%s3641_s13 + $0x2] sm:$0x1] }
 0x130   : > { %v663_v59 = vsel %vm644_vm7, %v642_v56, -inf  ;;  %vm1003_vm14 = vcmp.gt.f32.partialorder %v1002_v57, 0.5 }
 0x131   : > { %664 = vmax.xlane.f32.xlu1 %v663_v59  ;;  %v629_v61 = vsel %vm3724_vm5, %v615_v54, %v3781_v58  ;;  %v1165_v8 = vsel %vm1003_vm14, 1, %v3545_v0 }
 0x132   : > { %v643_v63 = vadd.f32 %v2770_v11, %v629_v61  ;;  %3203 = vpush %v1165_v8 }
 0x134   : > { %v666_v1 = vsel %vm644_vm7, %v643_v63, -inf }
 0x135   : > { %661 = vmax.xlane.f32.xlu1 %v660_v62 }
 0x139   : > { %667 = vmax.xlane.f32.xlu1 %v666_v1  ;;  %v3065_v1 = vpop.f32.mrb[0].mxu1 }
 0x13a   : > { %v864_v4 = vpop.f32.mrb[1].mxu1 }
 0x13b   : > { %v3066_v5 = vpop.f32.mrb[2].mxu1 }
 0x13c   : > { %v867_v8 = vpop.f32.mrb[3].mxu1 }
 0x14f   : > { %s3202_s15 = spop %3201 }
 0x163   : > { %s3204_s16 = spop %3203 }
 0x1ae   : > { %v3794_v3 = vpop.xlane.xlu1 %652 }
 0x1af   : > { %v671_v9 = vsub.f32 %v3739_v15, %v3794_v3 }
 0x1b1   : > { %v681_v10 = vmul.f32 1.442695, %v671_v9  ;;  %v3069_v9 = vpop.f32.mrb[4].mxu1 }
 0x1b2   : > { %v3798_v11 = vpop.xlane.xlu1 %646 }
 0x1b3   : > { %3317 = vpow2.f32 %v681_v10  ;;  %v669_v12 = vsub.f32 %v3747_v27, %v3798_v11  ;;  %v880_v10 = vpop.f32.mrb[5].mxu1 }
 0x1b5   : > { %v677_v13 = vmul.f32 1.442695, %v669_v12 }
 0x1b6   : > { %v3802_v14 = vpop.xlane.xlu0 %658  ;;  %v3804_v25 = vpop.xlane.xlu1 %655 }
 0x1b7   : > { %3319 = vpow2.f32 %v677_v13  ;;  %v673_v26 = vsub.f32 %v640_v41, %v3802_v14  ;;  %v672_v28 = vsub.f32 %v639_v37, %v3804_v25 }
 0x1b9   : > { %v685_v29 = vmul.f32 1.442695, %v673_v26  ;;  %v683_v30 = vmul.f32 1.442695, %v672_v28  ;;  %v3837_v26 = vpop.f32.mrb[8].mxu0 }
 0x1ba   : > { %v3808_v15 = vpop.xlane.xlu1 %649  ;;  %v3840_v28 = vpop.f32.mrb[9].mxu0 }
 0x1bb   : > { %3321 = vpow2.f32 %v685_v29  ;;  %v670_v33 = vsub.f32 %v637_v45, %v3808_v15 }
 0x1bc   : > { %3323 = vpow2.f32 %v683_v30  ;;  %v3845_v30 = vpop.f32.mrb[10].mxu0 }
 0x1bd   : > { %v3318_v34 = vpop.eup %3317  ;;  %v679_v27 = vmul.f32 1.442695, %v670_v33  ;;  %v3847_v33 = vpop.f32.mrb[11].mxu0 }
 0x1be   : > { %v3811_v35 = vpop.xlane.xlu1 %664  ;;  %v699_v36 = vsel %vm644_vm7, %v3318_v34, 0.0 }
 0x1bf   : > { %3325 = vpow2.f32 %v679_v27  ;;  %v675_v38 = vsub.f32 %v642_v56, %v3811_v35  ;;  %700 = vadd.xlane.f32.xlu1 %v699_v36  ;;  %v3070_v27 = vpop.f32.mrb[6].mxu1 }
 0x1c0   : > { %v883_v36 = vpop.f32.mrb[7].mxu1 }
 0x1c1   : > { %v3320_v39 = vpop.eup %3319  ;;  %v689_v37 = vmul.f32 1.442695, %v675_v38 }
 0x1c2   : > { %v3815_v40 = vpop.xlane.xlu1 %661  ;;  %v693_v41 = vsel %vm644_vm7, %v3320_v39, 0.0 }
 0x1c3   : > { %3327 = vpow2.f32 %v689_v37  ;;  %v674_v42 = vsub.f32 %v641_v60, %v3815_v40  ;;  %694 = vadd.xlane.f32.xlu1 %v693_v41  ;;  %v3859_v37 = vpop.f32.mrb[12].mxu0 }
 0x1c4   : > { %v3861_v41 = vpop.f32.mrb[13].mxu0 }
 0x1c5   : > { %v3322_v43 = vpop.eup %3321  ;;  %v687_v44 = vmul.f32 1.442695, %v674_v42  ;;  %v3864_v42 = vpop.f32.mrb[14].mxu0 }
 0x1c6   : > { %v3324_v45 = vpop.eup %3323  ;;  %v3819_v46 = vpop.xlane.xlu1 %667  ;;  %v705_v47 = vsel %vm644_vm7, %v3322_v43, 0.0 }
 0x1c7   : > { %3329 = vpow2.f32 %v687_v44  ;;  %v676_v50 = vsub.f32 %v643_v63, %v3819_v46  ;;  %706 = vadd.xlane.f32.xlu0 %v705_v47  ;;  %v702_v51 = vsel %vm644_vm7, %v3324_v45, 0.0  ;;  %v2787_v63 = vld [vmem:[%s3609_s28 + $0x1] ss:$0 sm:$0xff]  ;;  %v3866_v43 = vpop.f32.mrb[15].mxu0 }
 0x1c8   : > { %703 = vadd.xlane.f32.xlu1 %v702_v51  ;;  %v3829_v2 = vadd.f32 %v3065_v1, %v2787_v63  ;;  %v3831_v57 = vadd.f32 %v2787_v63, %v864_v4  ;;  %v3833_v12 = vadd.f32 %v3066_v5, %v2787_v63  ;;  %v3835_v13 = vadd.f32 %v2787_v63, %v880_v10  ;;  %v3277_v47 = vld [vmem:[%s3623_s10 + $0x60] sm:$0xff]   ;;  %v3279_v51 = vld [vmem:[%s3623_s10 + $0x68] sm:$0xff]   ;;  %v3281_v1 = vld [vmem:[%s3623_s10 + $0x70] sm:$0xff]  }
 0x1c9   : > { %v3326_v52 = vpop.eup %3325  ;;  %v691_v53 = vmul.f32 1.442695, %v676_v50  ;;  %v3842_v29 = vadd.f32 %v2787_v63, %v867_v8  ;;  %v3849_v34 = vadd.f32 %v3069_v9, %v2787_v63  ;;  %v3852_v38 = vadd.f32 %v2787_v63, %v883_v36  ;;  %v3278_v50 = vld [vmem:[%s3617_s7 + $0x80] sm:$0xff]   ;;  %3179 = vmatprep.subr.msk.bf16.mxu1 %vm528_vm1, %v3277_v47  ;;  %v3282_v4 = vld [vmem:[%s3617_s7 + $0x90] sm:$0xff]  }
 0x1ca   : > { %v696_v55 = vsel %vm644_vm7, %v3326_v52, 0.0  ;;  %v3854_v39 = vadd.f32 %v3070_v27, %v2787_v63  ;;  %v3280_v52 = vld [vmem:[%s3617_s7 + $0x88] sm:$0xff]   ;;  %3183 = vmatprep.subr.msk.bf16.mxu0 %vm528_vm1, %v3278_v50  ;;  %v897_v8 = vstv %s3202_s15 }
 0x1cb   : > { %3331 = vpow2.f32 %v691_v53  ;;  %v1632_v63 = vsel %vm528_vm1, %v3280_v52, 0  ;;  %vm3888_vm15 = vcmp.eq.s32.totalorder %v897_v8, 1 }
 0x1cc   : > { %697 = vadd.xlane.f32.xlu1 %v696_v55  ;;  %v1359_v55 = vsel %vm528_vm1, %v3277_v47, 0  ;;  %v899_v47 = vsel %vm3888_vm15, %v3831_v57, %v3730_v7 }
 0x1cd   : > { %v3328_v56 = vpop.eup %3327  ;;  %3088 = vmatpush3.bf16.xpose.msra.mxu1 %v1359_v55 }
 0x1ce   : > { %v711_v54 = vsel %vm644_vm7, %v3328_v56, 0.0  ;;  %v1629_v56 = vsel %vm528_vm1, %v3278_v50, 0  ;;  %3180 = vmatprep.subr.msk.bf16.mxu1 %vm528_vm1, %v3279_v51 }
 0x1cf   : > { %712 = vadd.xlane.f32.xlu0 %v711_v54  ;;  %v3285_v54 = vld [vmem:[%s3617_s7 + $0x60] sm:$0xff]   ;;  %3104 = vmatpush3.bf16.xpose.msra.mxu0 %v1629_v56  ;;  %v1365_v56 = vsel %vm528_vm1, %v3281_v1, 0 }
 0x1d0   : > { %3184 = vmatprep.subr.msk.bf16.mxu0 %vm528_vm1, %v3280_v52  ;;  %3095 = vmatprep.mubr.msk.bf16.mxu1 %vm528_vm1, %v3285_v54  ;;  %v1635_v54 = vsel %vm528_vm1, %v3282_v4, 0 }
 0x1d1   : > { %v3330_v59 = vpop.eup %3329 }
 0x1d2   : > { %v708_v60 = vsel %vm644_vm7, %v3330_v59, 0.0 }
 0x1d3   : > { %709 = vadd.xlane.f32.xlu1 %v708_v60  ;;  %v3287_v60 = vld [vmem:[%s3623_s10 + $0x80] sm:$0xff]  }
 0x1d4   : > { %3111 = vmatprep.mubr.msk.bf16.mxu0 %vm528_vm1, %v3287_v60  ;;  %v3284_v60 = vld [vmem:[%s3617_s7 + $0x98] sm:$0xff]  }
 0x1d5   : > { %v3332_v61 = vpop.eup %3331 }
 0x1d6   : > { %v714_v62 = vsel %vm644_vm7, %v3332_v61, 0.0 }
 0x1d7   : > { %715 = vadd.xlane.f32.xlu1 %v714_v62  ;;  %v1362_v62 = vsel %vm528_vm1, %v3279_v51, 0  ;;  %3106 = vmatpush3.bf16.xpose.msra.mxu0 %v1632_v63 }
 0x1d8   : > { %3090 = vmatpush3.bf16.xpose.msra.mxu1 %v1362_v62  ;;  %3185 = vmatprep.subr.msk.bf16.mxu0 %vm528_vm1, %v3282_v4 }
 0x1d9   : > { %3181 = vmatprep.subr.msk.bf16.mxu1 %vm528_vm1, %v3281_v1  ;;  %v901_v1 = vsel %vm3888_vm15, %v3829_v2, %v3728_v6 }
 0x1df   : > { %3108 = vmatpush3.bf16.xpose.msra.mxu0 %v1635_v54 }
 0x1e0   : > { %3092 = vmatpush3.bf16.xpose.msra.mxu1 %v1365_v56  ;;  %3186 = vmatprep.subr.msk.bf16.mxu0 %vm528_vm1, %v3284_v60 }
 0x1e5   : > { %1005 = vperm.xlu0 %3247, %v3652_v17  }
 0x1e8   : > { %1009 = vperm.xlu1 %3248, %v3655_v18  }
 0x1ec   : > { %1013 = vperm.xlu1 %3248, %v3658_v19  }
 0x1f0   : > { %1017 = vperm.xlu1 %3248, %v3661_v20  }
 0x1f4   : > { %1021 = vperm.xlu1 %3248, %v3664_v21  }
 0x1f8   : > { %1025 = vperm.xlu1 %3248, %v3667_v22  }
 0x1fc   : > { %1029 = vperm.xlu1 %3248, %v3670_v23  }
 0x200   : > { %1033 = vperm.xlu1 %3248, %v3673_v24  }
 0x24c   : > { %v701_v44 = vpop.xlane.xlu1 %700 }
 0x250   : > { %v695_v45 = vpop.xlane.xlu1 %694 }
 0x251   : > { %3333 = vlog2.f32 %v695_v45 }
 0x252   : > { %3335 = vlog2.f32 %v701_v44 }
 0x254   : > { %v707_v53 = vpop.xlane.xlu0 %706 }
 0x255   : > { %3337 = vlog2.f32 %v707_v53  ;;  %v704_v59 = vpop.xlane.xlu1 %703 }
 0x259   : > { %v698_v61 = vpop.xlane.xlu1 %697 }
 0x25a   : > { %3339 = vlog2.f32 %v698_v61 }
 0x25b   : > { %v3334_v5 = vpop.eup %3333  ;;  %3341 = vlog2.f32 %v704_v59  ;;  %v3283_v59 = vld [vmem:[%s3623_s10 + $0x78] sm:$0xff]  }
 0x25c   : > { %v718_v9 = vmul.f32 0.6931472, %v3334_v5  ;;  %v713_v10 = vpop.xlane.xlu0 %712  ;;  %v3336_v27 = vpop.eup %3335  ;;  %3182 = vmatprep.subr.msk.bf16.mxu1 %vm528_vm1, %v3283_v59 }
 0x25d   : > { %3343 = vlog2.f32 %v713_v10  ;;  %v722_v52 = vmul.f32 0.6931472, %v3336_v27  ;;  %v905_v10 = vsel %vm3888_vm15, %v3849_v34, %v3768_v48 }
 0x25e   : > { %v733_v36 = vadd.f32 %v718_v9, %v3798_v11  ;;  %v903_v11 = vsel %vm3888_vm15, %v3835_v13, %v3752_v31 }
 0x25f   : > { %v3338_v45 = vpop.eup %3337  ;;  %v735_v63 = vadd.f32 %v722_v52, %v3794_v3  ;;  %v900_v52 = vsel %vm3888_vm15, %v3842_v29, %v3754_v32 }
 0x260   : > { %v726_v50 = vmul.f32 0.6931472, %v3338_v45  ;;  %v710_v51 = vpop.xlane.xlu1 %709  ;;  %v3903_v55 = vadd.f32 %v899_v47, %v733_v36  ;;  %v1368_v36 = vsel %vm528_vm1, %v3283_v59, 0 }
 0x261   : > { %3345 = vlog2.f32 %v710_v51  ;;  %v3926_v27 = vadd.f32 %v901_v1, %v735_v63  ;;  %3094 = vmatpush3.bf16.xpose.msra.mxu1 %v1368_v36 }
 0x262   : > { %v737_v53 = vadd.f32 %v726_v50, %v3802_v14  ;;  %v915_v14 = vsel %vm644_vm7, %v3903_v55, -inf  ;;  %v1638_v50 = vsel %vm528_vm1, %v3284_v60, 0  ;;  %v902_v60 = vsel %vm3888_vm15, %v3833_v12, %v3741_v16 }
 0x263   : > { %3110 = vmatpush3.bf16.xpose.msra.mxu0 %v1638_v50  ;;  %v906_v12 = vsel %vm3888_vm15, %v3854_v39, %v3781_v58 }
 0x264   : > { %v3340_v57 = vpop.eup %3339  ;;  %v3909_v61 = vadd.f32 %v903_v11, %v737_v53  ;;  %v716_v62 = vpop.xlane.xlu1 %715  ;;  %v917_v53 = vsel %vm644_vm7, %v3926_v27, -inf }
 0x265   : > { %3347 = vlog2.f32 %v716_v62  ;;  %v3342_v13 = vpop.eup %3341  ;;  %v720_v5 = vmul.f32 0.6931472, %v3340_v57 }
 0x266   : > { %v919_v4 = vsel %vm644_vm7, %v3909_v61, -inf  ;;  %v724_v2 = vmul.f32 0.6931472, %v3342_v13  ;;  %v3288_v13 = vld [vmem:[%s3623_s10 + $0x88] sm:$0xff]  }
 0x267   : > { %v3344_v3 = vpop.eup %3343  ;;  %v920_v8 = vmax.f32 %v915_v14, %v919_v4  ;;  %v734_v45 = vadd.f32 %v720_v5, %v3808_v15  ;;  %v904_v15 = vsel %vm3888_vm15, %v3852_v38, %v3770_v49  ;;  %v3286_v38 = vld [vmem:[%s3617_s7 + $0x68] sm:$0xff]   ;;  %v3289_v5 = vld [vmem:[%s3617_s7 + $0x70] sm:$0xff]  }
 0x268   : > { %v730_v9 = vmul.f32 0.6931472, %v3344_v3  ;;  %v3291_v14 = vld [vmem:[%s3623_s10 + $0x90] sm:$0xff]   ;;  %3096 = vmatmul.mubr.msk.bf16.vlgmr.msra.gmra.mrb[8].mxu1 %vm528_vm1, %v3286_v38 }
 0x269   : > { %v908_v29 = vadd.f32 %v900_v52, %v734_v45  ;;  %3099 = vmatprep.mubr.msk.bf16.mxu1 %vm528_vm1, %v3289_v5  ;;  %v3290_v45 = vld [vmem:[%s3617_s7 + $0x78] sm:$0xff]  }
 0x26a   : > { %v739_v47 = vadd.f32 %v730_v9, %v3811_v35  ;;  %v736_v35 = vadd.f32 %v724_v2, %v3804_v25  ;;  %3112 = vmatmul.mubr.msk.bf16.vlgmr.msra.gmra.mrb[16].mxu0 %vm528_vm1, %v3288_v13 }
 0x26b   : > { %v3346_v51 = vpop.eup %3345  ;;  %v916_v1 = vsel %vm644_vm7, %v908_v29, -inf  ;;  %3115 = vmatprep.mubr.msk.bf16.mxu0 %vm528_vm1, %v3291_v14 }
 0x26c   : > { %v3936_v11 = vadd.f32 %v905_v10, %v739_v47  ;;  %v728_v34 = vmul.f32 0.6931472, %v3346_v51  ;;  %v910_v25 = vadd.f32 %v902_v60, %v736_v35  ;;  %v3292_v47 = vld [vmem:[%s3623_s10 + $0x98] sm:$0xff]  }
 0x26e   : > { %v923_v56 = vsel %vm644_vm7, %v3936_v11, -inf  ;;  %v738_v54 = vadd.f32 %v728_v34, %v3815_v40 }
 0x26f   : > { %v3348_v59 = vpop.eup %3347  ;;  %v924_v57 = vmax.f32 %v917_v53, %v923_v56 }
 0x270   : > { %v732_v62 = vmul.f32 0.6931472, %v3348_v59  ;;  %v912_v63 = vadd.f32 %v904_v15, %v738_v54  ;;  %3100 = vmatmul.mubr.msk.bf16.gmra.mrb[12].mxu1 %vm528_vm1, %v3290_v45 }
 0x272   : > { %v740_v40 = vadd.f32 %v732_v62, %v3819_v46  ;;  %v921_v4 = vsel %vm644_vm7, %v912_v63, -inf  ;;  %v918_v46 = vsel %vm644_vm7, %v910_v25, -inf  ;;  %3116 = vmatmul.mubr.msk.bf16.gmra.mrb[20].mxu0 %vm528_vm1, %v3292_v47 }
 0x273   : > { %v922_v3 = vmax.f32 %v916_v1, %v921_v4 }
 0x274   : > { %v914_v9 = vadd.f32 %v906_v12, %v740_v40 }
 0x275   : > { %v927_v10 = vmax.f32 %v920_v8, %v922_v3 }
 0x276   : > { %v925_v36 = vsel %vm644_vm7, %v914_v9, -inf }
 0x277   : > { %v926_v2 = vmax.f32 %v918_v46, %v925_v36 }
 0x279   : > { %v928_v44 = vmax.f32 %v924_v57, %v926_v2 }
 0x27b   : > { %v929_v39 = vmax.f32 %v927_v10, %v928_v44 }
 0x27d   : > { %v930_v50 = vrot.slane %v929_v39, 4 }
 0x27f   : > { %v931_v51 = vmax.f32 %v929_v39, %v930_v50 }
 0x281   : > { %v932_v8 = vrot.slane %v931_v51, 2 }
 0x283   : > { %v933_v52 = vmax.f32 %v931_v51, %v932_v8 }
 0x285   : > { %v934_v34 = vrot.slane %v933_v52, 1 }
 0x287   : > { %v3973_v53 = vmax.f32 %v933_v52, %v934_v34 }
 0x289   : > { %v936_v15 = vsub.f32 %v3903_v55, %v3973_v53  ;;  %v937_v35 = vsub.f32 %v908_v29, %v3973_v53  ;;  %v938_v56 = vsub.f32 %v3926_v27, %v3973_v53  ;;  %v939_v54 = vsub.f32 %v910_v25, %v3973_v53  ;;  %v1010_v25 = vpop.permute.xlu1 %1009 }
 0x28a   : > { %v940_v59 = vsub.f32 %v3909_v61, %v3973_v53  ;;  %v941_v60 = vsub.f32 %v912_v63, %v3973_v53  ;;  %v942_v57 = vsub.f32 %v3936_v11, %v3973_v53  ;;  %v943_v62 = vsub.f32 %v914_v9, %v3973_v53 }
 0x28b   : > { %v944_v38 = vmul.f32 1.442695, %v936_v15  ;;  %v946_v13 = vmul.f32 1.442695, %v937_v35  ;;  %v948_v55 = vmul.f32 1.442695, %v938_v56 }
 0x28c   : > { %v950_v5 = vmul.f32 1.442695, %v939_v54  ;;  %v952_v29 = vmul.f32 1.442695, %v940_v59  ;;  %v954_v27 = vmul.f32 1.442695, %v941_v60 }
 0x28d   : > { %3349 = vpow2.f32 %v944_v38  ;;  %v956_v14 = vmul.f32 1.442695, %v942_v57  ;;  %v958_v61 = vmul.f32 1.442695, %v943_v62  ;;  %v1014_v2 = vpop.permute.xlu1 %1013 }
 0x28e   : > { %3351 = vpow2.f32 %v946_v13 }
 0x28f   : > { %3353 = vpow2.f32 %v948_v55 }
 0x290   : > { %3355 = vpow2.f32 %v950_v5 }
 0x291   : > { %3357 = vpow2.f32 %v952_v29  ;;  %v1018_v15 = vpop.permute.xlu1 %1017 }
 0x292   : > { %3359 = vpow2.f32 %v954_v27  ;;  %v1006_v27 = vpop.permute.xlu0 %1005 }
 0x293   : > { %3361 = vpow2.f32 %v956_v14  ;;  %v1167_v14 = vstv %s3204_s16 }
 0x294   : > { %3363 = vpow2.f32 %v958_v61  ;;  %vm3996_vm2 = vcmp.eq.s32.totalorder %v1167_v14, 1 }
 0x295   : > { %v1022_v60 = vpop.permute.xlu1 %1021 }
 0x297   : > { %v3350_v63 = vpop.eup %3349 }
 0x298   : > { %v3352_v11 = vpop.eup %3351  ;;  %v960_v1 = vsel %vm644_vm7, %v3350_v63, 0.0  ;;  %v1135_v63 = vadd.f32 %v3840_v28, %v1006_v27 }
 0x299   : > { %v3354_v40 = vpop.eup %3353  ;;  %v961_v4 = vsel %vm644_vm7, %v3352_v11, 0.0  ;;  %v1026_v13 = vpop.permute.xlu1 %1025 }
 0x29a   : > { %v3356_v12 = vpop.eup %3355  ;;  %v962_v3 = vadd.f32 %v961_v4, %v960_v1  ;;  %v963_v9 = vsel %vm644_vm7, %v3354_v40, 0.0  ;;  %v1138_v1 = vadd.f32 %v3847_v33, %v1010_v25  ;;  %v1143_v40 = vadd.f32 %v3837_v26, %v1014_v2 }
 0x29b   : > { %v3358_v10 = vpop.eup %3357  ;;  %v965_v36 = vsel %vm644_vm7, %v3356_v12, 0.0  ;;  %v1146_v4 = vadd.f32 %v3845_v30, %v1018_v15 }
 0x29c   : > { %v964_v46 = vadd.f32 %v963_v9, %v962_v3  ;;  %v3360_v45 = vpop.eup %3359  ;;  %v967_v44 = vsel %vm644_vm7, %v3358_v10, 0.0  ;;  %v1151_v3 = vadd.f32 %v3861_v41, %v1022_v60  ;;  %v1154_v9 = vadd.f32 %v3866_v43, %v1026_v13 }
 0x29d   : > { %v3362_v39 = vpop.eup %3361  ;;  %v969_v51 = vsel %vm644_vm7, %v3360_v45, 0.0  ;;  %v1030_v29 = vpop.permute.xlu1 %1029  ;;  %v1170_v26 = vsel %vm3996_vm2, %v1138_v1, %v3754_v32  ;;  %v1171_v30 = vsel %vm3996_vm2, %v1143_v40, %v3728_v6  ;;  %v3548_v60 = vmov 4  }
 0x29e   : > { %v966_v47 = vadd.f32 %v965_v36, %v964_v46  ;;  %v3364_v8 = vpop.eup %3363  ;;  %v971_v34 = vsel %vm644_vm7, %v3362_v39, 0.0  ;;  %v1159_v10 = vadd.f32 %v3859_v37, %v1030_v29  ;;  %v1169_v36 = vsel %vm3996_vm2, %v1135_v63, %v3730_v7  ;;  %3250 = vset.pattern.permute.xlu1 %v3548_v60  ;;  %3249 = vset.pattern.permute.xlu0 %v3548_v60 }
 0x29f   : > { %v973_v56 = vsel %vm644_vm7, %v3364_v8, 0.0  ;;  %v1172_v37 = vsel %vm3996_vm2, %v1146_v4, %v3741_v16  ;;  %v1173_v41 = vsel %vm3996_vm2, %v1151_v3, %v3752_v31 }
 0x2a0   : > { %v968_v50 = vadd.f32 %v967_v44, %v966_v47  ;;  %v1175_v43 = vsel %vm3996_vm2, %v1159_v10, %v3768_v48 }
 0x2a1   : > { %v1034_v61 = vpop.permute.xlu1 %1033 }
 0x2a2   : > { %v970_v52 = vadd.f32 %v969_v51, %v968_v50  ;;  %v1162_v46 = vadd.f32 %v3864_v42, %v1034_v61  ;;  %v1174_v42 = vsel %vm3996_vm2, %v1154_v9, %v3770_v49 }
 0x2a4   : > { %v972_v35 = vadd.f32 %v971_v34, %v970_v52 }
 0x2a6   : > { %v974_v54 = vadd.f32 %v973_v56, %v972_v35 }
 0x2a8   : > { %v975_v59 = vrot.slane %v974_v54, 4 }
 0x2aa   : > { %v976_v57 = vadd.f32 %v975_v59, %v974_v54 }
 0x2ac   : > { %v977_v62 = vrot.slane %v976_v57, 2 }
 0x2ae   : > { %v978_v38 = vadd.f32 %v977_v62, %v976_v57  ;;  %v1299_v57 = vld [vmem:[%s3641_s13 + $0x3] sm:$0x1]  ;;  %v1542_v62 = vld [vmem:[%s3641_s13 + $0x4] sm:$0x1] }
 0x2af   : > { %vm1301_vm3 = vcmp.gt.f32.partialorder %v1299_v57, 0.5  ;;  %vm1543_vm4 = vcmp.gt.f32.partialorder %v1542_v62, 0.5 }
 0x2b0   : > { %v979_v55 = vrot.slane %v978_v38, 1  ;;  %v1705_v13 = vsel %vm1543_vm4, 1, %v3545_v0 }
 0x2b2   : > { %v980_v5 = vadd.f32 %v979_v55, %v978_v38  ;;  %v1435_v38 = vsel %vm1301_vm3, 1, %v3545_v0 }
 0x2b3   : > { %3205 = vpush %v1435_v38 }
 0x2b4   : > { %3365 = vlog2.f32 %v980_v5  ;;  %3207 = vpush %v1705_v13 }
 0x2be   : > { %v3366_v12 = vpop.eup %3365 }
 0x2bf   : > { %v982_v28 = vmul.f32 0.6931472, %v3366_v12 }
 0x2c1   : > { %v983_v33 = vadd.f32 %v982_v28, %v3973_v53  ;;  %v1176_v53 = vsel %vm3996_vm2, %v1162_v46, %v3781_v58 }
 0x2c3   : > { %v1177_v25 = vadd.f32 %v1169_v36, %v983_v33  ;;  %v1178_v2 = vadd.f32 %v1170_v26, %v983_v33  ;;  %v1179_v45 = vadd.f32 %v1171_v30, %v983_v33  ;;  %v1180_v47 = vadd.f32 %v1172_v37, %v983_v33 }
 0x2c4   : > { %v1181_v44 = vadd.f32 %v1173_v41, %v983_v33  ;;  %v1182_v39 = vadd.f32 %v1174_v42, %v983_v33  ;;  %v1183_v50 = vadd.f32 %v1175_v43, %v983_v33  ;;  %v1184_v51 = vadd.f32 %v1176_v53, %v983_v33 }
 0x2c5   : > { %v1185_v8 = vsel %vm644_vm7, %v1177_v25, -inf  ;;  %v1188_v52 = vsel %vm644_vm7, %v1178_v2, -inf  ;;  %v1191_v34 = vsel %vm644_vm7, %v1179_v45, -inf  ;;  %v1194_v15 = vsel %vm644_vm7, %v1180_v47, -inf }
 0x2c6   : > { %1186 = vmax.xlane.f32.xlu1 %v1185_v8  ;;  %1189 = vmax.xlane.f32.xlu0 %v1188_v52  ;;  %v1197_v35 = vsel %vm644_vm7, %v1181_v44, -inf  ;;  %v1200_v56 = vsel %vm644_vm7, %v1182_v39, -inf  ;;  %v1203_v54 = vsel %vm644_vm7, %v1183_v50, -inf  ;;  %v1206_v59 = vsel %vm644_vm7, %v1184_v51, -inf }
 0x2ca   : > { %1192 = vmax.xlane.f32.xlu0 %v1191_v34  ;;  %1195 = vmax.xlane.f32.xlu1 %v1194_v15 }
 0x2ce   : > { %1198 = vmax.xlane.f32.xlu0 %v1197_v35  ;;  %1201 = vmax.xlane.f32.xlu1 %v1200_v56 }
 0x2d2   : > { %1204 = vmax.xlane.f32.xlu0 %v1203_v54  ;;  %1207 = vmax.xlane.f32.xlu1 %v1206_v59  ;;  %v2844_v59 = vld [vmem:[%s3609_s28 + $0x3] ss:$0 sm:$0xff] }
 0x2e4   : > { %s3206_s17 = spop %3205 }
 0x2e5   : > { %s3208_s22 = spop %3207 }
 0x33b   : > { %v3097_v54 = vpop.f32.mrb[8].mxu1 }
 0x33c   : > { %v1404_v60 = vpop.f32.mrb[9].mxu1 }
 0x33d   : > { %v3098_v57 = vpop.f32.mrb[10].mxu1  ;;  %v4078_v38 = vadd.f32 %v2844_v59, %v1404_v60 }
 0x33e   : > { %v1407_v62 = vpop.f32.mrb[11].mxu1 }
 0x33f   : > { %v4080_v13 = vadd.f32 %v2844_v59, %v1407_v62 }
 0x353   : > { %v4044_v55 = vpop.xlane.xlu0 %1189  ;;  %v4046_v5 = vpop.xlane.xlu1 %1186 }
 0x354   : > { %v1210_v29 = vsub.f32 %v1178_v2, %v4044_v55  ;;  %v1209_v27 = vsub.f32 %v1177_v25, %v4046_v5 }
 0x356   : > { %v1219_v14 = vmul.f32 1.442695, %v1210_v29  ;;  %v1217_v61 = vmul.f32 1.442695, %v1209_v27  ;;  %v4082_v29 = vpop.f32.mrb[16].mxu0  ;;  %v4084_v27 = vadd.f32 %v3097_v54, %v2844_v59  ;;  %v3297_v54 = vld [vmem:[%s3623_s10 + $0xb0] sm:$0xff]  }
 0x357   : > { %v4050_v63 = vpop.xlane.xlu0 %1192  ;;  %v4052_v11 = vpop.xlane.xlu1 %1195 }
 0x358   : > { %3367 = vpow2.f32 %v1219_v14  ;;  %v1211_v1 = vsub.f32 %v1179_v45, %v4050_v63  ;;  %v1212_v40 = vsub.f32 %v1180_v47, %v4052_v11  ;;  %v4086_v14 = vadd.f32 %v3098_v57, %v2844_v59 }
 0x359   : > { %3369 = vpow2.f32 %v1217_v61  ;;  %v4088_v61 = vpop.f32.mrb[17].mxu0 }
 0x35a   : > { %v1221_v4 = vmul.f32 1.442695, %v1211_v1  ;;  %v1223_v12 = vmul.f32 1.442695, %v1212_v40  ;;  %v4091_v1 = vpop.f32.mrb[18].mxu0 }
 0x35b   : > { %v4056_v3 = vpop.xlane.xlu0 %1198  ;;  %v4058_v9 = vpop.xlane.xlu1 %1201 }
 0x35c   : > { %3371 = vpow2.f32 %v1221_v4  ;;  %v1213_v10 = vsub.f32 %v1181_v44, %v4056_v3  ;;  %v1214_v46 = vsub.f32 %v1182_v39, %v4058_v9  ;;  %v4094_v40 = vpop.f32.mrb[19].mxu0  ;;  %v3101_v4 = vpop.f32.mrb[12].mxu1 }
 0x35d   : > { %3373 = vpow2.f32 %v1223_v12  ;;  %v1420_v12 = vpop.f32.mrb[13].mxu1 }
 0x35e   : > { %v1225_v28 = vmul.f32 1.442695, %v1213_v10  ;;  %v1227_v36 = vmul.f32 1.442695, %v1214_v46  ;;  %v3102_v10 = vpop.f32.mrb[14].mxu1 }
 0x35f   : > { %v4062_v33 = vpop.xlane.xlu0 %1204  ;;  %v4064_v26 = vpop.xlane.xlu1 %1207 }
 0x360   : > { %3375 = vpow2.f32 %v1225_v28  ;;  %v1215_v30 = vsub.f32 %v1183_v50, %v4062_v33  ;;  %v1216_v37 = vsub.f32 %v1184_v51, %v4064_v26  ;;  %v1423_v46 = vpop.f32.mrb[15].mxu1  ;;  %v4097_v28 = vadd.f32 %v2844_v59, %v1420_v12 }
 0x361   : > { %3377 = vpow2.f32 %v1227_v36  ;;  %v4099_v36 = vadd.f32 %v2844_v59, %v1423_v46  ;;  %v1437_v12 = vstv %s3206_s17 }
 0x362   : > { %v3368_v41 = vpop.eup %3367  ;;  %v1229_v42 = vmul.f32 1.442695, %v1215_v30  ;;  %v1231_v43 = vmul.f32 1.442695, %v1216_v37  ;;  %v4101_v30 = vadd.f32 %v3101_v4, %v2844_v59  ;;  %v4103_v37 = vadd.f32 %v3102_v10, %v2844_v59  ;;  %v3298_v59 = vld [vmem:[%s3617_s7 + $0xd0] sm:$0xff]  }
 0x363   : > { %v3370_v53 = vpop.eup %3369  ;;  %v1236_v25 = vsel %vm644_vm7, %v3368_v41, 0.0  ;;  %v4107_v41 = vpop.f32.mrb[20].mxu0  ;;  %vm4137_vm5 = vcmp.eq.s32.totalorder %v1437_v12, 1 }
 0x364   : > { %3379 = vpow2.f32 %v1229_v42  ;;  %1237 = vadd.xlane.f32.xlu1 %v1236_v25  ;;  %v1233_v2 = vsel %vm644_vm7, %v3370_v53, 0.0  ;;  %v4110_v42 = vpop.f32.mrb[21].mxu0 }
 0x365   : > { %3381 = vpow2.f32 %v1231_v43  ;;  %1234 = vadd.xlane.f32.xlu0 %v1233_v2  ;;  %v4112_v43 = vpop.f32.mrb[22].mxu0  ;;  %v3293_v2 = vld [vmem:[%s3623_s10 + $0xa0] sm:$0xff]  }
 0x366   : > { %v3372_v45 = vpop.eup %3371  ;;  %v4115_v53 = vpop.f32.mrb[23].mxu0  ;;  %3187 = vmatprep.subr.msk.bf16.mxu1 %vm528_vm1, %v3293_v2 }
 0x367   : > { %v3374_v47 = vpop.eup %3373  ;;  %v1239_v44 = vsel %vm644_vm7, %v3372_v45, 0.0  ;;  %v3294_v45 = vld [vmem:[%s3617_s7 + $0xc0] sm:$0xff]  }
 0x368   : > { %v1242_v39 = vsel %vm644_vm7, %v3374_v47, 0.0  ;;  %v3295_v47 = vld [vmem:[%s3623_s10 + $0xa8] sm:$0xff]   ;;  %3191 = vmatprep.subr.msk.bf16.mxu0 %vm528_vm1, %v3294_v45 }
 0x369   : > { %1240 = vadd.xlane.f32.xlu0 %v1239_v44  ;;  %1243 = vadd.xlane.f32.xlu1 %v1242_v39  ;;  %v3296_v39 = vld [vmem:[%s3617_s7 + $0xc8] sm:$0xff]  }
 0x36a   : > { %v3376_v50 = vpop.eup %3375 }
 0x36b   : > { %v3378_v51 = vpop.eup %3377  ;;  %v1245_v8 = vsel %vm644_vm7, %v3376_v50, 0.0  ;;  %v1899_v50 = vsel %vm528_vm1, %v3293_v2, 0 }
 0x36c   : > { %v1248_v52 = vsel %vm644_vm7, %v3378_v51, 0.0  ;;  %v2169_v51 = vsel %vm528_vm1, %v3294_v45, 0  ;;  %3120 = vmatpush3.bf16.xpose.msra.mxu1 %v1899_v50  ;;  %v3299_v50 = vld [vmem:[%s3623_s10 + $0xb8] sm:$0xff]  }
 0x36d   : > { %1246 = vadd.xlane.f32.xlu0 %v1245_v8  ;;  %1249 = vadd.xlane.f32.xlu1 %v1248_v52  ;;  %v3301_v8 = vld [vmem:[%s3617_s7 + $0xa0] sm:$0xff]  }
 0x36e   : > { %v3380_v34 = vpop.eup %3379  ;;  %3136 = vmatpush3.bf16.xpose.msra.mxu0 %v2169_v51  ;;  %v3303_v52 = vld [vmem:[%s3623_s10 + $0xc0] sm:$0xff]   ;;  %3188 = vmatprep.subr.msk.bf16.mxu1 %vm528_vm1, %v3295_v47  ;;  %v3300_v51 = vld [vmem:[%s3617_s7 + $0xd8] sm:$0xff]  }
 0x36f   : > { %v3382_v15 = vpop.eup %3381  ;;  %v1251_v35 = vsel %vm644_vm7, %v3380_v34, 0.0  ;;  %3192 = vmatprep.subr.msk.bf16.mxu0 %vm528_vm1, %v3296_v39  ;;  %3127 = vmatprep.mubr.msk.bf16.mxu1 %vm528_vm1, %v3301_v8 }
 0x370   : > { %v1254_v56 = vsel %vm644_vm7, %v3382_v15, 0.0  ;;  %3143 = vmatprep.mubr.msk.bf16.mxu0 %vm528_vm1, %v3303_v52 }
 0x371   : > { %1252 = vadd.xlane.f32.xlu0 %v1251_v35  ;;  %1255 = vadd.xlane.f32.xlu1 %v1254_v56  ;;  %v1902_v35 = vsel %vm528_vm1, %v3295_v47, 0  ;;  %v2172_v56 = vsel %vm528_vm1, %v3296_v39, 0  ;;  %v2175_v39 = vsel %vm528_vm1, %v3298_v59, 0 }
 0x374   : > { %3122 = vmatpush3.bf16.xpose.msra.mxu1 %v1902_v35  ;;  %v1440_v35 = vsel %vm4137_vm5, %v4080_v13, %v3754_v32  ;;  %v1443_v13 = vsel %vm4137_vm5, %v4097_v28, %v3752_v31  ;;  %v1908_v28 = vsel %vm528_vm1, %v3299_v50, 0 }
 0x375   : > { %3189 = vmatprep.subr.msk.bf16.mxu1 %vm528_vm1, %v3297_v54 }
 0x376   : > { %3138 = vmatpush3.bf16.xpose.msra.mxu0 %v2172_v56 }
 0x377   : > { %3193 = vmatprep.subr.msk.bf16.mxu0 %vm528_vm1, %v3298_v59 }
 0x37e   : > { %3140 = vmatpush3.bf16.xpose.msra.mxu0 %v2175_v39 }
 0x37f   : > { %3194 = vmatprep.subr.msk.bf16.mxu0 %vm528_vm1, %v3300_v51 }
 0x382   : > { %1549 = vperm.xlu1 %3250, %v3655_v18  }
 0x386   : > { %1553 = vperm.xlu1 %3250, %v3658_v19  }
 0x387   : > { %1545 = vperm.xlu0 %3249, %v3652_v17  }
 0x38a   : > { %1557 = vperm.xlu1 %3250, %v3661_v20  }
 0x38e   : > { %1561 = vperm.xlu1 %3250, %v3664_v21  }
 0x392   : > { %1565 = vperm.xlu1 %3250, %v3667_v22  }
 0x396   : > { %1569 = vperm.xlu1 %3250, %v3670_v23  }
 0x39a   : > { %1573 = vperm.xlu1 %3250, %v3673_v24  }
 0x3f1   : > { %v1238_v25 = vpop.xlane.xlu1 %1237 }
 0x3f2   : > { %v1235_v44 = vpop.xlane.xlu0 %1234  ;;  %3383 = vlog2.f32 %v1238_v25 }
 0x3f3   : > { %3385 = vlog2.f32 %v1235_v44  ;;  %v1905_v44 = vsel %vm528_vm1, %v3297_v54, 0  ;;  %v1439_v54 = vsel %vm4137_vm5, %v4078_v38, %v3730_v7  ;;  %v1444_v38 = vsel %vm4137_vm5, %v4099_v36, %v3770_v49 }
 0x3f4   : > { %3124 = vmatpush3.bf16.xpose.msra.mxu1 %v1905_v44  ;;  %v1442_v36 = vsel %vm4137_vm5, %v4086_v14, %v3741_v16 }
 0x3f5   : > { %3190 = vmatprep.subr.msk.bf16.mxu1 %vm528_vm1, %v3299_v50 }
 0x3f6   : > { %v1241_v34 = vpop.xlane.xlu0 %1240  ;;  %v1244_v15 = vpop.xlane.xlu1 %1243 }
 0x3f7   : > { %3387 = vlog2.f32 %v1241_v34 }
 0x3f8   : > { %3389 = vlog2.f32 %v1244_v15 }
 0x3fa   : > { %v1247_v60 = vpop.xlane.xlu0 %1246  ;;  %v1250_v57 = vpop.xlane.xlu1 %1249 }
 0x3fb   : > { %3391 = vlog2.f32 %v1247_v60 }
 0x3fc   : > { %v3384_v62 = vpop.eup %3383  ;;  %3393 = vlog2.f32 %v1250_v57  ;;  %3126 = vmatpush3.bf16.xpose.msra.mxu1 %v1908_v28  ;;  %v3308_v28 = vld [vmem:[%s3623_s10 + $0xd8] sm:$0xff]  }
 0x3fd   : > { %v3386_v4 = vpop.eup %3385  ;;  %v1260_v25 = vmul.f32 0.6931472, %v3384_v62 }
 0x3fe   : > { %v1253_v10 = vpop.xlane.xlu0 %1252  ;;  %v1256_v46 = vpop.xlane.xlu1 %1255  ;;  %v1258_v2 = vmul.f32 0.6931472, %v3386_v4 }
 0x3ff   : > { %3395 = vlog2.f32 %v1253_v10  ;;  %v1274_v52 = vadd.f32 %v1260_v25, %v4044_v55 }
 0x400   : > { %3397 = vlog2.f32 %v1256_v46  ;;  %v1273_v34 = vadd.f32 %v1258_v2, %v4046_v5  ;;  %v2178_v2 = vsel %vm528_vm1, %v3300_v51, 0 }
 0x401   : > { %v3388_v45 = vpop.eup %3387  ;;  %v4161_v57 = vadd.f32 %v1440_v35, %v1274_v52  ;;  %3142 = vmatpush3.bf16.xpose.msra.mxu0 %v2178_v2 }
 0x402   : > { %v3390_v8 = vpop.eup %3389  ;;  %v1262_v15 = vmul.f32 0.6931472, %v3388_v45  ;;  %v4165_v12 = vadd.f32 %v1439_v54, %v1273_v34  ;;  %v3302_v54 = vld [vmem:[%s3617_s7 + $0xa8] sm:$0xff]  }
 0x403   : > { %v1264_v60 = vmul.f32 0.6931472, %v3390_v8  ;;  %v1456_v50 = vsel %vm644_vm7, %v4161_v57, -inf  ;;  %3128 = vmatmul.mubr.msk.bf16.vlgmr.msra.gmra.mrb[16].mxu1 %vm528_vm1, %v3302_v54 }
 0x404   : > { %v1275_v62 = vadd.f32 %v1262_v15, %v4050_v63  ;;  %v1455_v8 = vsel %vm644_vm7, %v4165_v12, -inf }
 0x405   : > { %v3392_v56 = vpop.eup %3391  ;;  %v1276_v46 = vadd.f32 %v1264_v60, %v4052_v11 }
 0x406   : > { %v3394_v55 = vpop.eup %3393  ;;  %v1266_v5 = vmul.f32 0.6931472, %v3392_v56 }
 0x407   : > { %v1268_v59 = vmul.f32 0.6931472, %v3394_v55  ;;  %v1450_v34 = vadd.f32 %v1442_v36, %v1276_v46  ;;  %v3304_v55 = vld [vmem:[%s3623_s10 + $0xc8] sm:$0xff]  }
 0x408   : > { %v1277_v4 = vadd.f32 %v1266_v5, %v4056_v3  ;;  %v1441_v3 = vsel %vm4137_vm5, %v4084_v27, %v3728_v6  ;;  %3144 = vmatmul.mubr.msk.bf16.vlgmr.msra.gmra.mrb[24].mxu0 %vm528_vm1, %v3304_v55 }
 0x409   : > { %v3396_v10 = vpop.eup %3395  ;;  %v1278_v25 = vadd.f32 %v1268_v59, %v4058_v9  ;;  %v1445_v9 = vsel %vm4137_vm5, %v4101_v30, %v3768_v48  ;;  %v1449_v51 = vadd.f32 %v1441_v3, %v1275_v62  ;;  %v3307_v62 = vld [vmem:[%s3623_s10 + $0xd0] sm:$0xff]  }
 0x40a   : > { %v3398_v45 = vpop.eup %3397  ;;  %v1270_v63 = vmul.f32 0.6931472, %v3396_v10  ;;  %v1451_v44 = vadd.f32 %v1443_v13, %v1277_v4  ;;  %v3305_v13 = vld [vmem:[%s3617_s7 + $0xb0] sm:$0xff]   ;;  %3147 = vmatprep.mubr.msk.bf16.mxu0 %vm528_vm1, %v3307_v62 }
 0x40b   : > { %v1272_v11 = vmul.f32 0.6931472, %v3398_v45  ;;  %v1452_v39 = vadd.f32 %v1444_v38, %v1278_v25  ;;  %v1457_v5 = vsel %vm644_vm7, %v1449_v51, -inf  ;;  %v1458_v38 = vsel %vm644_vm7, %v1450_v34, -inf  ;;  %3131 = vmatprep.mubr.msk.bf16.mxu1 %vm528_vm1, %v3305_v13  ;;  %v3306_v25 = vld [vmem:[%s3617_s7 + $0xb8] sm:$0xff]  }
 0x40c   : > { %v1279_v27 = vadd.f32 %v1270_v63, %v4062_v33  ;;  %v1459_v14 = vsel %vm644_vm7, %v1451_v44, -inf  ;;  %v1446_v33 = vsel %vm4137_vm5, %v4103_v37, %v3781_v58  ;;  %3132 = vmatmul.mubr.msk.bf16.gmra.mrb[20].mxu1 %vm528_vm1, %v3306_v25 }
 0x40d   : > { %v1280_v30 = vadd.f32 %v1272_v11, %v4064_v26  ;;  %v1460_v52 = vmax.f32 %v1455_v8, %v1459_v14  ;;  %v1461_v15 = vsel %vm644_vm7, %v1452_v39, -inf }
 0x40e   : > { %v1453_v35 = vadd.f32 %v1445_v9, %v1279_v27  ;;  %v1462_v56 = vmax.f32 %v1456_v50, %v1461_v15 }
 0x40f   : > { %v1454_v60 = vadd.f32 %v1446_v33, %v1280_v30 }
 0x410   : > { %v1463_v26 = vsel %vm644_vm7, %v1453_v35, -inf  ;;  %v1467_v59 = vmax.f32 %v1460_v52, %v1462_v56  ;;  %3148 = vmatmul.mubr.msk.bf16.gmra.mrb[28].mxu0 %vm528_vm1, %v3308_v28 }
 0x411   : > { %v1464_v4 = vmax.f32 %v1457_v5, %v1463_v26  ;;  %v1465_v10 = vsel %vm644_vm7, %v1454_v60, -inf }
 0x412   : > { %v1466_v47 = vmax.f32 %v1458_v38, %v1465_v10 }
 0x414   : > { %v1468_v37 = vmax.f32 %v1464_v4, %v1466_v47 }
 0x416   : > { %v1469_v46 = vmax.f32 %v1467_v59, %v1468_v37 }
 0x418   : > { %v1470_v2 = vrot.slane %v1469_v46, 4 }
 0x41a   : > { %v1471_v45 = vmax.f32 %v1469_v46, %v1470_v2 }
 0x41c   : > { %v1472_v63 = vrot.slane %v1471_v45, 2 }
 0x41e   : > { %v1473_v3 = vmax.f32 %v1471_v45, %v1472_v63 }
 0x420   : > { %v1474_v36 = vrot.slane %v1473_v3, 1 }
 0x422   : > { %v4215_v11 = vmax.f32 %v1473_v3, %v1474_v36 }
 0x424   : > { %v1476_v9 = vsub.f32 %v4165_v12, %v4215_v11  ;;  %v1477_v50 = vsub.f32 %v4161_v57, %v4215_v11  ;;  %v1478_v27 = vsub.f32 %v1449_v51, %v4215_v11  ;;  %v1479_v8 = vsub.f32 %v1450_v34, %v4215_v11  ;;  %v1550_v34 = vpop.permute.xlu1 %1549 }
 0x425   : > { %v1480_v14 = vsub.f32 %v1451_v44, %v4215_v11  ;;  %v1481_v30 = vsub.f32 %v1452_v39, %v4215_v11  ;;  %v1482_v52 = vsub.f32 %v1453_v35, %v4215_v11  ;;  %v1483_v15 = vsub.f32 %v1454_v60, %v4215_v11 }
 0x426   : > { %v1484_v33 = vmul.f32 1.442695, %v1476_v9  ;;  %v1486_v56 = vmul.f32 1.442695, %v1477_v50  ;;  %v1488_v54 = vmul.f32 1.442695, %v1478_v27 }
 0x427   : > { %v1490_v55 = vmul.f32 1.442695, %v1479_v8  ;;  %v1492_v12 = vmul.f32 1.442695, %v1480_v14  ;;  %v1494_v57 = vmul.f32 1.442695, %v1481_v30 }
 0x428   : > { %3399 = vpow2.f32 %v1484_v33  ;;  %v1496_v51 = vmul.f32 1.442695, %v1482_v52  ;;  %v1498_v44 = vmul.f32 1.442695, %v1483_v15  ;;  %v1554_v47 = vpop.permute.xlu1 %1553 }
 0x429   : > { %3401 = vpow2.f32 %v1486_v56 }
 0x42a   : > { %3403 = vpow2.f32 %v1488_v54 }
 0x42b   : > { %3405 = vpow2.f32 %v1490_v55 }
 0x42c   : > { %3407 = vpow2.f32 %v1492_v12  ;;  %v1558_v9 = vpop.permute.xlu1 %1557 }
 0x42d   : > { %3409 = vpow2.f32 %v1494_v57  ;;  %v1707_v57 = vstv %s3208_s22 }
 0x42e   : > { %3411 = vpow2.f32 %v1496_v51  ;;  %v1546_v51 = vpop.permute.xlu0 %1545  ;;  %vm4236_vm6 = vcmp.eq.s32.totalorder %v1707_v57, 1 }
 0x42f   : > { %3413 = vpow2.f32 %v1498_v44 }
 0x430   : > { %v1562_v30 = vpop.permute.xlu1 %1561 }
 0x432   : > { %v3400_v39 = vpop.eup %3399 }
 0x433   : > { %v3402_v35 = vpop.eup %3401  ;;  %v1500_v60 = vsel %vm644_vm7, %v3400_v39, 0.0  ;;  %v1678_v39 = vadd.f32 %v4094_v40, %v1550_v34 }
 0x434   : > { %v3404_v5 = vpop.eup %3403  ;;  %v1501_v26 = vsel %vm644_vm7, %v3402_v35, 0.0  ;;  %v1566_v56 = vpop.permute.xlu1 %1565 }
 0x435   : > { %v3406_v59 = vpop.eup %3405  ;;  %v1502_v13 = vadd.f32 %v1501_v26, %v1500_v60  ;;  %v1503_v62 = vsel %vm644_vm7, %v3404_v5, 0.0  ;;  %v1675_v60 = vadd.f32 %v4088_v61, %v1546_v51  ;;  %v1683_v5 = vadd.f32 %v4082_v29, %v1554_v47 }
 0x436   : > { %v3408_v4 = vpop.eup %3407  ;;  %v1505_v10 = vsel %vm644_vm7, %v3406_v59, 0.0  ;;  %v1686_v26 = vadd.f32 %v4091_v1, %v1558_v9  ;;  %v1710_v34 = vsel %vm4236_vm6, %v1678_v39, %v3754_v32 }
 0x437   : > { %v1504_v38 = vadd.f32 %v1503_v62, %v1502_v13  ;;  %v3410_v37 = vpop.eup %3409  ;;  %v1507_v25 = vsel %vm644_vm7, %v3408_v4, 0.0  ;;  %v1691_v13 = vadd.f32 %v4110_v42, %v1562_v30  ;;  %v1694_v62 = vadd.f32 %v4115_v53, %v1566_v56 }
 0x438   : > { %v3412_v28 = vpop.eup %3411  ;;  %v1509_v45 = vsel %vm644_vm7, %v3410_v37, 0.0  ;;  %v1570_v12 = vpop.permute.xlu1 %1569  ;;  %v1709_v29 = vsel %vm4236_vm6, %v1675_v60, %v3730_v7  ;;  %v1711_v1 = vsel %vm4236_vm6, %v1683_v5, %v3728_v6  ;;  %v3549_v30 = vmov 6  }
 0x439   : > { %v1506_v46 = vadd.f32 %v1505_v10, %v1504_v38  ;;  %v3414_v63 = vpop.eup %3413  ;;  %v1511_v36 = vsel %vm644_vm7, %v3412_v28, 0.0  ;;  %v1699_v4 = vadd.f32 %v4107_v41, %v1570_v12  ;;  %v1712_v41 = vsel %vm4236_vm6, %v1686_v26, %v3741_v16  ;;  %3251 = vset.pattern.permute.xlu1 %v3549_v30  ;;  %3252 = vset.pattern.permute.xlu0 %v3549_v30 }
 0x43a   : > { %v1513_v27 = vsel %vm644_vm7, %v3414_v63, 0.0  ;;  %v1713_v42 = vsel %vm4236_vm6, %v1691_v13, %v3752_v31  ;;  %v1714_v53 = vsel %vm4236_vm6, %v1694_v62, %v3770_v49 }
 0x43b   : > { %v1508_v2 = vadd.f32 %v1507_v25, %v1506_v46 }
 0x43c   : > { %v1574_v44 = vpop.permute.xlu1 %1573 }
 0x43d   : > { %v1510_v3 = vadd.f32 %v1509_v45, %v1508_v2  ;;  %v1702_v38 = vadd.f32 %v4112_v43, %v1574_v44  ;;  %v1715_v43 = vsel %vm4236_vm6, %v1699_v4, %v3768_v48 }
 0x43f   : > { %v1512_v50 = vadd.f32 %v1511_v36, %v1510_v3 }
 0x441   : > { %v1514_v8 = vadd.f32 %v1513_v27, %v1512_v50 }
 0x443   : > { %v1515_v14 = vrot.slane %v1514_v8, 4 }
 0x445   : > { %v1516_v52 = vadd.f32 %v1515_v14, %v1514_v8 }
 0x447   : > { %v1517_v15 = vrot.slane %v1516_v52, 2 }
 0x449   : > { %v1518_v33 = vadd.f32 %v1517_v15, %v1516_v52  ;;  %v1839_v52 = vld [vmem:[%s3641_s13 + $0x5] sm:$0x1]  ;;  %v2082_v15 = vld [vmem:[%s3641_s13 + $0x6] sm:$0x1] }
 0x44a   : > { %vm1841_vm8 = vcmp.gt.f32.partialorder %v1839_v52, 0.5  ;;  %vm2083_vm9 = vcmp.gt.f32.partialorder %v2082_v15, 0.5 }
 0x44b   : > { %v1519_v54 = vrot.slane %v1518_v33, 1  ;;  %v2245_v56 = vsel %vm2083_vm9, 1, %v3545_v0 }
 0x44d   : > { %v1520_v55 = vadd.f32 %v1519_v54, %v1518_v33  ;;  %v1975_v33 = vsel %vm1841_vm8, 1, %v3545_v0 }
 0x44e   : > { %3209 = vpush %v1975_v33 }
 0x44f   : > { %3415 = vlog2.f32 %v1520_v55  ;;  %3211 = vpush %v2245_v56 }
 0x459   : > { %v3416_v59 = vpop.eup %3415 }
 0x45a   : > { %v1522_v40 = vmul.f32 0.6931472, %v3416_v59 }
 0x45c   : > { %v1523_v61 = vadd.f32 %v1522_v40, %v4215_v11  ;;  %v1716_v11 = vsel %vm4236_vm6, %v1702_v38, %v3781_v58 }
 0x45e   : > { %v1717_v10 = vadd.f32 %v1709_v29, %v1523_v61  ;;  %v1718_v47 = vadd.f32 %v1710_v34, %v1523_v61  ;;  %v1719_v37 = vadd.f32 %v1711_v1, %v1523_v61  ;;  %v1721_v46 = vadd.f32 %v1713_v42, %v1523_v61 }
 0x45f   : > { %v1720_v25 = vadd.f32 %v1712_v41, %v1523_v61  ;;  %v1723_v28 = vadd.f32 %v1715_v43, %v1523_v61  ;;  %v1722_v2 = vadd.f32 %v1714_v53, %v1523_v61  ;;  %v4272_v45 = vadd.f32 %v1716_v11, %v1523_v61 }
 0x460   : > { %v1725_v63 = vsel %vm644_vm7, %v1717_v10, -inf  ;;  %v1728_v3 = vsel %vm644_vm7, %v1718_v47, -inf  ;;  %v1731_v36 = vsel %vm644_vm7, %v1719_v37, -inf  ;;  %v1737_v9 = vsel %vm644_vm7, %v1721_v46, -inf }
 0x461   : > { %1726 = vmax.xlane.f32.xlu1 %v1725_v63  ;;  %1729 = vmax.xlane.f32.xlu0 %v1728_v3  ;;  %v1734_v50 = vsel %vm644_vm7, %v1720_v25, -inf  ;;  %v1743_v27 = vsel %vm644_vm7, %v1723_v28, -inf  ;;  %v1740_v8 = vsel %vm644_vm7, %v1722_v2, -inf  ;;  %v1746_v14 = vsel %vm644_vm7, %v4272_v45, -inf }
 0x465   : > { %1732 = vmax.xlane.f32.xlu0 %v1731_v36  ;;  %1738 = vmax.xlane.f32.xlu1 %v1737_v9 }
 0x469   : > { %1735 = vmax.xlane.f32.xlu0 %v1734_v50  ;;  %1744 = vmax.xlane.f32.xlu1 %v1743_v27 }
 0x46d   : > { %1741 = vmax.xlane.f32.xlu0 %v1740_v8 }
 0x471   : > { %1747 = vmax.xlane.f32.xlu0 %v1746_v14  ;;  %v2901_v14 = vld [vmem:[%s3609_s28 + $0x5] ss:$0 sm:$0xff] }
 0x47f   : > { %s3210_s23 = spop %3209 }
 0x480   : > { %s3212_s24 = spop %3211 }
 0x4d6   : > { %v3129_v8 = vpop.f32.mrb[16].mxu1 }
 0x4d7   : > { %v1944_v30 = vpop.f32.mrb[17].mxu1 }
 0x4d8   : > { %v3130_v52 = vpop.f32.mrb[18].mxu1  ;;  %v4322_v33 = vadd.f32 %v2901_v14, %v1944_v30 }
 0x4d9   : > { %v1947_v15 = vpop.f32.mrb[19].mxu1 }
 0x4da   : > { %v4324_v56 = vadd.f32 %v2901_v14, %v1947_v15 }
 0x4ee   : > { %v4287_v54 = vpop.xlane.xlu0 %1729  ;;  %v4289_v55 = vpop.xlane.xlu1 %1726 }
 0x4ef   : > { %v1750_v12 = vsub.f32 %v1718_v47, %v4287_v54  ;;  %v1749_v57 = vsub.f32 %v1717_v10, %v4289_v55 }
 0x4f1   : > { %v1759_v51 = vmul.f32 1.442695, %v1750_v12  ;;  %v1757_v44 = vmul.f32 1.442695, %v1749_v57  ;;  %v4327_v12 = vpop.f32.mrb[24].mxu0 }
 0x4f2   : > { %v4293_v39 = vpop.xlane.xlu0 %1732  ;;  %v4295_v35 = vpop.xlane.xlu1 %1738 }
 0x4f3   : > { %3417 = vpow2.f32 %v1759_v51  ;;  %v1751_v60 = vsub.f32 %v1719_v37, %v4293_v39  ;;  %v1753_v5 = vsub.f32 %v1721_v46, %v4295_v35  ;;  %v4329_v57 = vpop.f32.mrb[25].mxu0  ;;  %v4331_v51 = vadd.f32 %v3129_v8, %v2901_v14 }
 0x4f4   : > { %3419 = vpow2.f32 %v1757_v44  ;;  %v4333_v44 = vadd.f32 %v3130_v52, %v2901_v14 }
 0x4f5   : > { %v1761_v26 = vmul.f32 1.442695, %v1751_v60  ;;  %v1765_v59 = vmul.f32 1.442695, %v1753_v5 }
 0x4f6   : > { %v4299_v13 = vpop.xlane.xlu0 %1735  ;;  %v4301_v62 = vpop.xlane.xlu1 %1744 }
 0x4f7   : > { %3421 = vpow2.f32 %v1761_v26  ;;  %v1752_v4 = vsub.f32 %v1720_v25, %v4299_v13  ;;  %v1755_v38 = vsub.f32 %v1723_v28, %v4301_v62  ;;  %v4340_v26 = vpop.f32.mrb[26].mxu0 }
 0x4f8   : > { %3423 = vpow2.f32 %v1765_v59 }
 0x4f9   : > { %v1763_v40 = vmul.f32 1.442695, %v1752_v4  ;;  %v1769_v34 = vmul.f32 1.442695, %v1755_v38 }
 0x4fa   : > { %v4305_v61 = vpop.xlane.xlu0 %1741 }
 0x4fb   : > { %3425 = vpow2.f32 %v1763_v40  ;;  %v1754_v29 = vsub.f32 %v1722_v2, %v4305_v61 }
 0x4fc   : > { %3427 = vpow2.f32 %v1769_v34 }
 0x4fd   : > { %v3418_v1 = vpop.eup %3417  ;;  %v1767_v41 = vmul.f32 1.442695, %v1754_v29 }
 0x4fe   : > { %v3420_v42 = vpop.eup %3419  ;;  %v4308_v43 = vpop.xlane.xlu0 %1747  ;;  %v1776_v53 = vsel %vm644_vm7, %v3418_v1, 0.0  ;;  %v3309_v1 = vld [vmem:[%s3623_s10 + $0xe0] sm:$0xff]  }
 0x4ff   : > { %3429 = vpow2.f32 %v1767_v41  ;;  %v1756_v11 = vsub.f32 %v4272_v45, %v4308_v43  ;;  %1777 = vadd.xlane.f32.xlu0 %v1776_v53  ;;  %v1773_v10 = vsel %vm644_vm7, %v3420_v42, 0.0  ;;  %v3310_v41 = vld [vmem:[%s3623_s10 + $0xe8] sm:$0xff]   ;;  %v3313_v42 = vld [vmem:[%s3617_s7 + $0xe0] sm:$0xff]   ;;  %3195 = vmatprep.subr.msk.bf16.mxu1 %vm528_vm1, %v3309_v1 }
 0x500   : > { %1774 = vadd.xlane.f32.xlu1 %v1773_v10  ;;  %3159 = vmatprep.mubr.msk.bf16.mxu1 %vm528_vm1, %v3313_v42  ;;  %v3311_v10 = vld [vmem:[%s3623_s10 + $0xf0] sm:$0xff]  }
 0x501   : > { %v3422_v47 = vpop.eup %3421  ;;  %v1771_v37 = vmul.f32 1.442695, %v1756_v11 }
 0x502   : > { %v1779_v46 = vsel %vm644_vm7, %v3422_v47, 0.0  ;;  %v3424_v25 = vpop.eup %3423 }
 0x503   : > { %3431 = vpow2.f32 %v1771_v37  ;;  %v1785_v63 = vsel %vm644_vm7, %v3424_v25, 0.0 }
 0x504   : > { %1780 = vadd.xlane.f32.xlu1 %v1779_v46 }
 0x505   : > { %v3426_v28 = vpop.eup %3425 }
 0x506   : > { %v1782_v2 = vsel %vm644_vm7, %v3426_v28, 0.0  ;;  %v3428_v3 = vpop.eup %3427 }
 0x507   : > { %1783 = vadd.xlane.f32.xlu0 %v1782_v2  ;;  %v1791_v9 = vsel %vm644_vm7, %v3428_v3, 0.0  ;;  %v1977_v2 = vstv %s3210_s23  ;;  %v3312_v3 = vld [vmem:[%s3623_s10 + $0xf8] sm:$0xff]  }
 0x508   : > { %1786 = vadd.xlane.f32.xlu1 %v1785_v63  ;;  %v2445_v63 = vsel %vm528_vm1, %v3311_v10, 0  ;;  %vm4373_vm10 = vcmp.eq.s32.totalorder %v1977_v2, 1 }
 0x509   : > { %v3430_v45 = vpop.eup %3429 }
 0x50a   : > { %v1788_v36 = vsel %vm644_vm7, %v3430_v45, 0.0 }
 0x50b   : > { %1789 = vadd.xlane.f32.xlu0 %v1788_v36 }
 0x50c   : > { %1792 = vadd.xlane.f32.xlu1 %v1791_v9 }
 0x50d   : > { %v3432_v50 = vpop.eup %3431 }
 0x50e   : > { %v1794_v27 = vsel %vm644_vm7, %v3432_v50, 0.0 }
 0x50f   : > { %1795 = vadd.xlane.f32.xlu0 %v1794_v27 }
 0x51d   : > { %2085 = vperm.xlu1 %3251, %v3652_v17   ;;  %v3133_v17 = vpop.f32.mrb[20].mxu1 }
 0x51e   : > { %v1960_v60 = vpop.f32.mrb[21].mxu1  ;;  %v4342_v59 = vadd.f32 %v3133_v17, %v2901_v14  ;;  %v1979_v17 = vsel %vm4373_vm10, %v4322_v33, %v3730_v7  ;;  %v1980_v33 = vsel %vm4373_vm10, %v4324_v56, %v3754_v32 }
 0x51f   : > { %v4337_v5 = vadd.f32 %v2901_v14, %v1960_v60 }
 0x521   : > { %2093 = vperm.xlu1 %3251, %v3658_v19   ;;  %v3134_v19 = vpop.f32.mrb[22].mxu1 }
 0x522   : > { %v1963_v4 = vpop.f32.mrb[23].mxu1 }
 0x523   : > { %v4344_v38 = vadd.f32 %v2901_v14, %v1963_v4 }
 0x525   : > { %2097 = vperm.xlu1 %3251, %v3661_v20   ;;  %2089 = vperm.xlu0 %3252, %v3655_v18   ;;  %v4346_v20 = vpop.f32.mrb[27].mxu0  ;;  %v4348_v18 = vadd.f32 %v3134_v19, %v2901_v14 }
 0x526   : > { %v4351_v40 = vpop.f32.mrb[28].mxu0 }
 0x527   : > { %v4353_v34 = vpop.f32.mrb[29].mxu0 }
 0x529   : > { %2101 = vperm.xlu1 %3251, %v3664_v21   ;;  %v4356_v21 = vpop.f32.mrb[30].mxu0 }
 0x52a   : > { %v4358_v29 = vpop.f32.mrb[31].mxu0 }
 0x52d   : > { %2105 = vperm.xlu1 %3251, %v3667_v22   ;;  %v2439_v22 = vsel %vm528_vm1, %v3309_v1, 0  ;;  %v1983_v1 = vsel %vm4373_vm10, %v4337_v5, %v3752_v31  ;;  %v1981_v5 = vsel %vm4373_vm10, %v4331_v51, %v3728_v6 }
 0x52e   : > { %3152 = vmatpush3.bf16.xpose.msra.mxu1 %v2439_v22 }
 0x52f   : > { %3196 = vmatprep.subr.msk.bf16.mxu1 %vm528_vm1, %v3310_v41 }
 0x531   : > { %2109 = vperm.xlu1 %3251, %v3670_v23  }
 0x535   : > { %2113 = vperm.xlu1 %3251, %v3673_v24   ;;  %v2442_v24 = vsel %vm528_vm1, %v3310_v41, 0  ;;  %v2448_v41 = vsel %vm528_vm1, %v3312_v3, 0 }
 0x536   : > { %3154 = vmatpush3.bf16.xpose.msra.mxu1 %v2442_v24 }
 0x537   : > { %3197 = vmatprep.subr.msk.bf16.mxu1 %vm528_vm1, %v3311_v10  ;;  %v1985_v10 = vsel %vm4373_vm10, %v4342_v59, %v3768_v48  ;;  %v3315_v59 = vld [vmem:[%s3617_s7 + $0xf0] sm:$0xff]  }
 0x53e   : > { %3156 = vmatpush3.bf16.xpose.msra.mxu1 %v2445_v63 }
 0x53f   : > { %3198 = vmatprep.subr.msk.bf16.mxu1 %vm528_vm1, %v3312_v3 }
 0x546   : > { %3158 = vmatpush3.bf16.xpose.msra.mxu1 %v2448_v41 }
 0x58c   : > { %v1778_v11 = vpop.xlane.xlu0 %1777 }
 0x58d   : > { %v1775_v53 = vpop.xlane.xlu1 %1774 }
 0x58e   : > { %3433 = vlog2.f32 %v1775_v53 }
 0x58f   : > { %3435 = vlog2.f32 %v1778_v11 }
 0x591   : > { %v1781_v23 = vpop.xlane.xlu1 %1780 }
 0x592   : > { %3437 = vlog2.f32 %v1781_v23 }
 0x594   : > { %v1784_v47 = vpop.xlane.xlu0 %1783 }
 0x595   : > { %3439 = vlog2.f32 %v1784_v47  ;;  %v1787_v37 = vpop.xlane.xlu1 %1786 }
 0x596   : > { %3441 = vlog2.f32 %v1787_v37 }
 0x598   : > { %v3434_v46 = vpop.eup %3433  ;;  %v1790_v25 = vpop.xlane.xlu0 %1789 }
 0x599   : > { %3443 = vlog2.f32 %v1790_v25  ;;  %v1793_v28 = vpop.xlane.xlu1 %1792  ;;  %v3436_v45 = vpop.eup %3435  ;;  %v1798_v36 = vmul.f32 0.6931472, %v3434_v46 }
 0x59a   : > { %3445 = vlog2.f32 %v1793_v28  ;;  %v1800_v8 = vmul.f32 0.6931472, %v3436_v45 }
 0x59b   : > { %v1813_v30 = vadd.f32 %v1798_v36, %v4289_v55 }
 0x59c   : > { %v3438_v9 = vpop.eup %3437  ;;  %v1796_v50 = vpop.xlane.xlu0 %1795  ;;  %v1814_v19 = vadd.f32 %v1800_v8, %v4287_v54 }
 0x59d   : > { %3447 = vlog2.f32 %v1796_v50  ;;  %v1802_v52 = vmul.f32 0.6931472, %v3438_v9  ;;  %v1987_v53 = vadd.f32 %v1979_v17, %v1813_v30 }
 0x59e   : > { %v1988_v51 = vadd.f32 %v1980_v33, %v1814_v19  ;;  %v3316_v19 = vld [vmem:[%s3617_s7 + $0xf8] sm:$0xff]  }
 0x59f   : > { %v3440_v14 = vpop.eup %3439  ;;  %v1815_v55 = vadd.f32 %v1802_v52, %v4293_v39  ;;  %v1984_v39 = vsel %vm4373_vm10, %v4344_v38, %v3770_v49  ;;  %v1995_v25 = vsel %vm644_vm7, %v1987_v53, -inf }
 0x5a0   : > { %v3442_v15 = vpop.eup %3441  ;;  %v1804_v4 = vmul.f32 0.6931472, %v3440_v14  ;;  %v1996_v36 = vsel %vm644_vm7, %v1988_v51, -inf  ;;  %v1986_v14 = vsel %vm4373_vm10, %v4348_v18, %v3781_v58 }
 0x5a1   : > { %v1806_v60 = vmul.f32 0.6931472, %v3442_v15  ;;  %v1989_v46 = vadd.f32 %v1981_v5, %v1815_v55 }
 0x5a3   : > { %v3444_v42 = vpop.eup %3443  ;;  %v1817_v22 = vadd.f32 %v1806_v60, %v4295_v35  ;;  %v1816_v35 = vadd.f32 %v1804_v4, %v4299_v13  ;;  %v3314_v13 = vld [vmem:[%s3617_s7 + $0xe8] sm:$0xff]   ;;  %v1997_v50 = vsel %vm644_vm7, %v1989_v46, -inf }
 0x5a4   : > { %v3446_v54 = vpop.eup %3445  ;;  %v1808_v11 = vmul.f32 0.6931472, %v3444_v42  ;;  %3160 = vmatmul.mubr.msk.bf16.vlgmr.msra.gmra.mrb[24].mxu1 %vm528_vm1, %v3314_v13 }
 0x5a5   : > { %v1810_v23 = vmul.f32 0.6931472, %v3446_v54  ;;  %v1991_v24 = vadd.f32 %v1983_v1, %v1817_v22  ;;  %3163 = vmatprep.mubr.msk.bf16.mxu1 %vm528_vm1, %v3315_v59 }
 0x5a6   : > { %v1818_v56 = vadd.f32 %v1808_v11, %v4305_v61  ;;  %v1982_v61 = vsel %vm4373_vm10, %v4333_v44, %v3741_v16 }
 0x5a7   : > { %v3448_v47 = vpop.eup %3447  ;;  %v1819_v37 = vadd.f32 %v1810_v23, %v4301_v62  ;;  %v1999_v38 = vsel %vm644_vm7, %v1991_v24, -inf  ;;  %v1990_v62 = vadd.f32 %v1982_v61, %v1816_v35 }
 0x5a8   : > { %v1812_v28 = vmul.f32 0.6931472, %v3448_v47  ;;  %v2000_v2 = vmax.f32 %v1995_v25, %v1999_v38  ;;  %v1992_v63 = vadd.f32 %v1984_v39, %v1818_v56 }
 0x5a9   : > { %v1993_v3 = vadd.f32 %v1985_v10, %v1819_v37  ;;  %v1998_v15 = vsel %vm644_vm7, %v1990_v62, -inf }
 0x5aa   : > { %v1820_v45 = vadd.f32 %v1812_v28, %v4308_v43  ;;  %v2001_v9 = vsel %vm644_vm7, %v1992_v63, -inf  ;;  %v2086_v28 = vpop.permute.xlu1 %2085 }
 0x5ab   : > { %v2003_v8 = vsel %vm644_vm7, %v1993_v3, -inf  ;;  %v2002_v30 = vmax.f32 %v1996_v36, %v2001_v9 }
 0x5ac   : > { %v2004_v44 = vmax.f32 %v1997_v50, %v2003_v8  ;;  %v1994_v52 = vadd.f32 %v1986_v14, %v1820_v45  ;;  %3164 = vmatmul.mubr.msk.bf16.gmra.mrb[28].mxu1 %vm528_vm1, %v3316_v19 }
 0x5ad   : > { %v2007_v43 = vmax.f32 %v2000_v2, %v2002_v30 }
 0x5ae   : > { %v2005_v17 = vsel %vm644_vm7, %v1994_v52, -inf  ;;  %v2094_v9 = vpop.permute.xlu1 %2093 }
 0x5af   : > { %v2006_v60 = vmax.f32 %v1998_v15, %v2005_v17 }
 0x5b1   : > { %v2008_v4 = vmax.f32 %v2004_v44, %v2006_v60 }
 0x5b2   : > { %v2098_v19 = vpop.permute.xlu1 %2097 }
 0x5b3   : > { %v2009_v1 = vmax.f32 %v2007_v43, %v2008_v4 }
 0x5b5   : > { %v2010_v27 = vrot.slane %v2009_v1, 4 }
 0x5b7   : > { %v2011_v18 = vmax.f32 %v2009_v1, %v2010_v27 }
 0x5b9   : > { %v2012_v41 = vrot.slane %v2011_v18, 2 }
 0x5bb   : > { %v2013_v42 = vmax.f32 %v2011_v18, %v2012_v41  ;;  %v2102_v41 = vpop.permute.xlu1 %2101 }
 0x5bd   : > { %v2014_v55 = vrot.slane %v2013_v42, 1 }
 0x5bf   : > { %v4433_v22 = vmax.f32 %v2013_v42, %v2014_v55 }
 0x5c1   : > { %v2016_v33 = vsub.f32 %v1987_v53, %v4433_v22  ;;  %v2017_v54 = vsub.f32 %v1988_v51, %v4433_v22  ;;  %v2018_v11 = vsub.f32 %v1989_v46, %v4433_v22  ;;  %v2019_v5 = vsub.f32 %v1990_v62, %v4433_v22 }
 0x5c2   : > { %v2020_v23 = vsub.f32 %v1991_v24, %v4433_v22  ;;  %v2021_v39 = vsub.f32 %v1992_v63, %v4433_v22  ;;  %v2022_v35 = vsub.f32 %v1993_v3, %v4433_v22  ;;  %v2023_v56 = vsub.f32 %v1994_v52, %v4433_v22 }
 0x5c3   : > { %v2024_v10 = vmul.f32 1.442695, %v2016_v33  ;;  %v2026_v47 = vmul.f32 1.442695, %v2017_v54  ;;  %v2028_v37 = vmul.f32 1.442695, %v2018_v11  ;;  %v2106_v54 = vpop.permute.xlu1 %2105 }
 0x5c4   : > { %v2030_v25 = vmul.f32 1.442695, %v2019_v5  ;;  %v2032_v53 = vmul.f32 1.442695, %v2020_v23  ;;  %v2034_v51 = vmul.f32 1.442695, %v2021_v39  ;;  %v2247_v39 = vstv %s3212_s24 }
 0x5c5   : > { %3449 = vpow2.f32 %v2024_v10  ;;  %v2036_v46 = vmul.f32 1.442695, %v2022_v35  ;;  %v2038_v24 = vmul.f32 1.442695, %v2023_v56  ;;  %v2090_v35 = vpop.permute.xlu0 %2089  ;;  %v2215_v10 = vadd.f32 %v4329_v57, %v2086_v28 }
 0x5c6   : > { %3451 = vpow2.f32 %v2026_v47  ;;  %vm4452_vm1 = vcmp.eq.s32.totalorder %v2247_v39, 1 }
 0x5c7   : > { %3453 = vpow2.f32 %v2028_v37  ;;  %v2110_v23 = vpop.permute.xlu1 %2109  ;;  %v2223_v37 = vadd.f32 %v4327_v12, %v2094_v9  ;;  %v2249_v28 = vsel %vm4452_vm1, %v2215_v10, %v3730_v7 }
 0x5c8   : > { %3455 = vpow2.f32 %v2030_v25  ;;  %v2218_v25 = vadd.f32 %v4346_v20, %v2090_v35 }
 0x5c9   : > { %3457 = vpow2.f32 %v2032_v53  ;;  %v2226_v53 = vadd.f32 %v4340_v26, %v2098_v19  ;;  %v2251_v20 = vsel %vm4452_vm1, %v2223_v37, %v3728_v6 }
 0x5ca   : > { %3459 = vpow2.f32 %v2034_v51  ;;  %v2250_v26 = vsel %vm4452_vm1, %v2218_v25, %v3754_v32 }
 0x5cb   : > { %3461 = vpow2.f32 %v2036_v46  ;;  %v2114_v56 = vpop.permute.xlu1 %2113  ;;  %v2231_v46 = vadd.f32 %v4353_v34, %v2102_v41 }
 0x5cc   : > { %3463 = vpow2.f32 %v2038_v24  ;;  %v2234_v24 = vadd.f32 %v4358_v29, %v2106_v54 }
 0x5cd   : > { %v2253_v34 = vsel %vm4452_vm1, %v2231_v46, %v3752_v31 }
 0x5cf   : > { %v3450_v38 = vpop.eup %3449 }
 0x5d0   : > { %v3452_v2 = vpop.eup %3451  ;;  %v2040_v63 = vsel %vm644_vm7, %v3450_v38, 0.0  ;;  %v2239_v38 = vadd.f32 %v4351_v40, %v2110_v23  ;;  %v2252_v40 = vsel %vm4452_vm1, %v2226_v53, %v3741_v16 }
 0x5d1   : > { %v3454_v13 = vpop.eup %3453  ;;  %v2041_v3 = vsel %vm644_vm7, %v3452_v2, 0.0  ;;  %v2242_v2 = vadd.f32 %v4356_v21, %v2114_v56  ;;  %v2254_v21 = vsel %vm4452_vm1, %v2234_v24, %v3770_v49 }
 0x5d2   : > { %v3456_v61 = vpop.eup %3455  ;;  %v2042_v59 = vadd.f32 %v2041_v3, %v2040_v63  ;;  %v2043_v45 = vsel %vm644_vm7, %v3454_v13, 0.0  ;;  %v2255_v29 = vsel %vm4452_vm1, %v2239_v38, %v3768_v48 }
 0x5d3   : > { %v3458_v62 = vpop.eup %3457  ;;  %v2045_v50 = vsel %vm644_vm7, %v3456_v61, 0.0 }
 0x5d4   : > { %v2044_v36 = vadd.f32 %v2043_v45, %v2042_v59  ;;  %v3460_v8 = vpop.eup %3459  ;;  %v2047_v30 = vsel %vm644_vm7, %v3458_v62, 0.0 }
 0x5d5   : > { %v3462_v44 = vpop.eup %3461  ;;  %v2049_v43 = vsel %vm644_vm7, %v3460_v8, 0.0 }
 0x5d6   : > { %v2046_v14 = vadd.f32 %v2045_v50, %v2044_v36  ;;  %v3464_v15 = vpop.eup %3463  ;;  %v2051_v60 = vsel %vm644_vm7, %v3462_v44, 0.0 }
 0x5d7   : > { %v2053_v1 = vsel %vm644_vm7, %v3464_v15, 0.0  ;;  %v2379_v15 = vld [vmem:[%s3641_s13 + $0x7] sm:$0x1] }
 0x5d8   : > { %v2048_v52 = vadd.f32 %v2047_v30, %v2046_v14  ;;  %vm2381_vm11 = vcmp.gt.f32.partialorder %v2379_v15, 0.5 }
 0x5da   : > { %v2050_v17 = vadd.f32 %v2049_v43, %v2048_v52 }
 0x5dc   : > { %v2052_v4 = vadd.f32 %v2051_v60, %v2050_v17  ;;  %v2515_v17 = vsel %vm2381_vm11, 1, %v3545_v0 }
 0x5dd   : > { %3213 = vpush %v2515_v17 }
 0x5de   : > { %v2054_v27 = vadd.f32 %v2053_v1, %v2052_v4 }
 0x5e0   : > { %v2055_v18 = vrot.slane %v2054_v27, 4 }
 0x5e2   : > { %v2056_v42 = vadd.f32 %v2055_v18, %v2054_v27 }
 0x5e4   : > { %v2057_v55 = vrot.slane %v2056_v42, 2 }
 0x5e6   : > { %v2058_v33 = vadd.f32 %v2057_v55, %v2056_v42 }
 0x5e8   : > { %v2059_v11 = vrot.slane %v2058_v33, 1 }
 0x5ea   : > { %v2060_v5 = vadd.f32 %v2059_v11, %v2058_v33 }
 0x5ec   : > { %3465 = vlog2.f32 %v2060_v5 }
 0x5f6   : > { %v3466_v51 = vpop.eup %3465 }
 0x5f7   : > { %v2062_v57 = vmul.f32 0.6931472, %v3466_v51 }
 0x5f9   : > { %v2063_v12 = vadd.f32 %v2062_v57, %v4433_v22  ;;  %v2256_v22 = vsel %vm4452_vm1, %v2242_v2, %v3781_v58 }
 0x5fb   : > { %v2258_v63 = vadd.f32 %v2250_v26, %v2063_v12  ;;  %v2257_v13 = vadd.f32 %v2249_v28, %v2063_v12  ;;  %v2259_v3 = vadd.f32 %v2251_v20, %v2063_v12  ;;  %v2260_v61 = vadd.f32 %v2252_v40, %v2063_v12 }
 0x5fc   : > { %v2261_v59 = vadd.f32 %v2253_v34, %v2063_v12  ;;  %v2262_v45 = vadd.f32 %v2254_v21, %v2063_v12  ;;  %v2263_v62 = vadd.f32 %v2255_v29, %v2063_v12  ;;  %v2264_v36 = vadd.f32 %v2256_v22, %v2063_v12 }
 0x5fd   : > { %v2268_v9 = vsel %vm644_vm7, %v2258_v63, -inf  ;;  %v2265_v50 = vsel %vm644_vm7, %v2257_v13, -inf  ;;  %v2271_v8 = vsel %vm644_vm7, %v2259_v3, -inf  ;;  %v2274_v14 = vsel %vm644_vm7, %v2260_v61, -inf }
 0x5fe   : > { %2269 = vmax.xlane.f32.xlu0 %v2268_v9  ;;  %2266 = vmax.xlane.f32.xlu1 %v2265_v50  ;;  %v2277_v30 = vsel %vm644_vm7, %v2261_v59, -inf  ;;  %v2280_v44 = vsel %vm644_vm7, %v2262_v45, -inf  ;;  %v2283_v52 = vsel %vm644_vm7, %v2263_v62, -inf  ;;  %v2286_v43 = vsel %vm644_vm7, %v2264_v36, -inf }
 0x602   : > { %2272 = vmax.xlane.f32.xlu1 %v2271_v8  ;;  %2275 = vmax.xlane.f32.xlu0 %v2274_v14 }
 0x606   : > { %2278 = vmax.xlane.f32.xlu1 %v2277_v30  ;;  %2281 = vmax.xlane.f32.xlu0 %v2280_v44 }
 0x60a   : > { %2284 = vmax.xlane.f32.xlu1 %v2283_v52  ;;  %2287 = vmax.xlane.f32.xlu0 %v2286_v43 }
 0x60e   : > { %s3214_s25 = spop %3213 }
 0x68b   : > { %v4498_v60 = vpop.xlane.xlu0 %2269  ;;  %v4500_v19 = vpop.xlane.xlu1 %2266 }
 0x68c   : > { %v2290_v4 = vsub.f32 %v2258_v63, %v4498_v60  ;;  %v2289_v1 = vsub.f32 %v2257_v13, %v4500_v19 }
 0x68e   : > { %v2299_v27 = vmul.f32 1.442695, %v2290_v4  ;;  %v2297_v18 = vmul.f32 1.442695, %v2289_v1 }
 0x68f   : > { %v4504_v41 = vpop.xlane.xlu0 %2275  ;;  %v4506_v42 = vpop.xlane.xlu1 %2272 }
 0x690   : > { %3467 = vpow2.f32 %v2299_v27  ;;  %v2292_v55 = vsub.f32 %v2260_v61, %v4504_v41  ;;  %v2291_v0 = vsub.f32 %v2259_v3, %v4506_v42  ;;  %v3161_v3 = vpop.f32.mrb[24].mxu1  ;;  %v2958_v61 = vld [vmem:[%s3609_s28 + $0x7] ss:$0 sm:$0xff]  ;;  %s360_s28 = scalar_lea.vmem %s4616_s5, %s4638_s18 }
 0x691   : > { %3469 = vpow2.f32 %v2297_v18  ;;  %v4531_v50 = vadd.f32 %v3161_v3, %v2958_v61 }
 0x692   : > { %v2303_v33 = vmul.f32 1.442695, %v2292_v55  ;;  %v2301_v54 = vmul.f32 1.442695, %v2291_v0 }
 0x693   : > { %v4510_v11 = vpop.xlane.xlu0 %2281  ;;  %v4512_v5 = vpop.xlane.xlu1 %2278 }
 0x694   : > { %3471 = vpow2.f32 %v2303_v33  ;;  %v2294_v23 = vsub.f32 %v2262_v45, %v4510_v11  ;;  %v2293_v39 = vsub.f32 %v2261_v59, %v4512_v5  ;;  %v2484_v59 = vpop.f32.mrb[25].mxu1 }
 0x695   : > { %3473 = vpow2.f32 %v2301_v54  ;;  %v3162_v45 = vpop.f32.mrb[26].mxu1 }
 0x696   : > { %v2307_v35 = vmul.f32 1.442695, %v2294_v23  ;;  %v2305_v56 = vmul.f32 1.442695, %v2293_v39  ;;  %v4533_v8 = vadd.f32 %v3162_v45, %v2958_v61  ;;  %v2517_v39 = vstv %s3214_s25 }
 0x697   : > { %v4516_v10 = vpop.xlane.xlu0 %2287  ;;  %v4518_v47 = vpop.xlane.xlu1 %2284  ;;  %vm4539_vm12 = vcmp.eq.s32.totalorder %v2517_v39, 1 }
 0x698   : > { %3475 = vpow2.f32 %v2307_v35  ;;  %v2296_v37 = vsub.f32 %v2264_v36, %v4516_v10  ;;  %v2295_v25 = vsub.f32 %v2263_v62, %v4518_v47  ;;  %v2487_v62 = vpop.f32.mrb[27].mxu1  ;;  %v2485_v36 = vadd.f32 %v2958_v61, %v2484_v59 }
 0x699   : > { %3477 = vpow2.f32 %v2305_v56  ;;  %v2488_v9 = vadd.f32 %v2958_v61, %v2487_v62  ;;  %v3165_v14 = vpop.f32.mrb[28].mxu1 }
 0x69a   : > { %v3468_v53 = vpop.eup %3467  ;;  %v2311_v51 = vmul.f32 1.442695, %v2296_v37  ;;  %v2309_v46 = vmul.f32 1.442695, %v2295_v25  ;;  %v2500_v30 = vpop.f32.mrb[29].mxu1  ;;  %v4535_v43 = vadd.f32 %v3165_v14, %v2958_v61 }
 0x69b   : > { %v3470_v24 = vpop.eup %3469  ;;  %v2316_v38 = vsel %vm644_vm7, %v3468_v53, 0.0  ;;  %v3166_v44 = vpop.f32.mrb[30].mxu1  ;;  %v2501_v15 = vadd.f32 %v2958_v61, %v2500_v30 }
 0x69c   : > { %3479 = vpow2.f32 %v2311_v51  ;;  %2317 = vadd.xlane.f32.xlu0 %v2316_v38  ;;  %v2313_v2 = vsel %vm644_vm7, %v3470_v24, 0.0  ;;  %v2503_v52 = vpop.f32.mrb[31].mxu1  ;;  %v4537_v4 = vadd.f32 %v3166_v44, %v2958_v61 }
 0x69d   : > { %3481 = vpow2.f32 %v2309_v46  ;;  %2314 = vadd.xlane.f32.xlu1 %v2313_v2  ;;  %v2504_v17 = vadd.f32 %v2958_v61, %v2503_v52 }
 0x69e   : > { %v3472_v57 = vpop.eup %3471 }
 0x69f   : > { %v3474_v28 = vpop.eup %3473  ;;  %v2322_v12 = vsel %vm644_vm7, %v3472_v57, 0.0  ;;  %v2520_v57 = vsel %vm4539_vm12, %v2488_v9, %v3754_v32  ;;  %v2523_v32 = vsel %vm4539_vm12, %v2501_v15, %v3752_v31 }
 0x6a0   : > { %2323 = vadd.xlane.f32.xlu0 %v2322_v12  ;;  %v2319_v26 = vsel %vm644_vm7, %v3474_v28, 0.0 }
 0x6a1   : > { %2320 = vadd.xlane.f32.xlu1 %v2319_v26  ;;  %v2519_v26 = vsel %vm4539_vm12, %v2485_v36, %v3730_v7 }
 0x6a2   : > { %v3476_v20 = vpop.eup %3475 }
 0x6a3   : > { %v3478_v40 = vpop.eup %3477  ;;  %v2328_v34 = vsel %vm644_vm7, %v3476_v20, 0.0 }
 0x6a4   : > { %2329 = vadd.xlane.f32.xlu0 %v2328_v34  ;;  %v2325_v21 = vsel %vm644_vm7, %v3478_v40, 0.0 }
 0x6a5   : > { %2326 = vadd.xlane.f32.xlu1 %v2325_v21 }
 0x6a6   : > { %v3480_v29 = vpop.eup %3479 }
 0x6a7   : > { %v3482_v22 = vpop.eup %3481  ;;  %v2334_v63 = vsel %vm644_vm7, %v3480_v29, 0.0 }
 0x6a8   : > { %2335 = vadd.xlane.f32.xlu0 %v2334_v63  ;;  %v2331_v13 = vsel %vm644_vm7, %v3482_v22, 0.0 }
 0x6a9   : > { %2332 = vadd.xlane.f32.xlu1 %v2331_v13 }
 0x729   : > { %v2318_v1 = vpop.xlane.xlu0 %2317 }
 0x72a   : > { %3483 = vlog2.f32 %v2318_v1  ;;  %v2315_v27 = vpop.xlane.xlu1 %2314 }
 0x72b   : > { %3485 = vlog2.f32 %v2315_v27 }
 0x72d   : > { %v2324_v18 = vpop.xlane.xlu0 %2323 }
 0x72e   : > { %3487 = vlog2.f32 %v2324_v18  ;;  %v2321_v55 = vpop.xlane.xlu1 %2320 }
 0x72f   : > { %3489 = vlog2.f32 %v2321_v55 }
 0x731   : > { %v2330_v0 = vpop.xlane.xlu0 %2329 }
 0x732   : > { %3491 = vlog2.f32 %v2330_v0  ;;  %v2327_v33 = vpop.xlane.xlu1 %2326 }
 0x733   : > { %3493 = vlog2.f32 %v2327_v33 }
 0x734   : > { %v3484_v54 = vpop.eup %3483 }
 0x735   : > { %v3486_v23 = vpop.eup %3485  ;;  %v2336_v35 = vpop.xlane.xlu0 %2335  ;;  %v2340_v56 = vmul.f32 0.6931472, %v3484_v54 }
 0x736   : > { %3495 = vlog2.f32 %v2336_v35  ;;  %v2333_v37 = vpop.xlane.xlu1 %2332  ;;  %v2338_v25 = vmul.f32 0.6931472, %v3486_v23 }
 0x737   : > { %3497 = vlog2.f32 %v2333_v37  ;;  %v2354_v24 = vadd.f32 %v2340_v56, %v4498_v60  ;;  %v2524_v60 = vsel %vm4539_vm12, %v2504_v17, %v3770_v49  ;;  %v2521_v49 = vsel %vm4539_vm12, %v4531_v50, %v3728_v6 }
 0x738   : > { %v3488_v53 = vpop.eup %3487  ;;  %v2353_v38 = vadd.f32 %v2338_v25, %v4500_v19 }
 0x739   : > { %v3490_v46 = vpop.eup %3489  ;;  %v2344_v2 = vmul.f32 0.6931472, %v3488_v53  ;;  %v2528_v21 = vadd.f32 %v2520_v57, %v2354_v24 }
 0x73a   : > { %v2342_v12 = vmul.f32 0.6931472, %v3490_v46  ;;  %v2527_v22 = vadd.f32 %v2519_v26, %v2353_v38 }
 0x73b   : > { %v2356_v19 = vadd.f32 %v2344_v2, %v4504_v41  ;;  %v2522_v41 = vsel %vm4539_vm12, %v4533_v8, %v3741_v16 }
 0x73c   : > { %v3492_v28 = vpop.eup %3491  ;;  %v2355_v7 = vadd.f32 %v2342_v12, %v4506_v42  ;;  %v2526_v42 = vsel %vm4539_vm12, %v4537_v4, %v3781_v58  ;;  %v2535_v62 = vsel %vm644_vm7, %v2527_v22, -inf  ;;  %v2525_v58 = vsel %vm4539_vm12, %v4535_v43, %v3768_v48 }
 0x73d   : > { %v3494_v20 = vpop.eup %3493  ;;  %v2348_v40 = vmul.f32 0.6931472, %v3492_v28  ;;  %v2530_v6 = vadd.f32 %v2522_v41, %v2356_v19 }
 0x73e   : > { %v2346_v34 = vmul.f32 0.6931472, %v3494_v20  ;;  %v2529_v16 = vadd.f32 %v2521_v49, %v2355_v7 }
 0x73f   : > { %v2358_v29 = vadd.f32 %v2348_v40, %v4510_v11 }
 0x740   : > { %v3496_v63 = vpop.eup %3495  ;;  %v2357_v13 = vadd.f32 %v2346_v34, %v4512_v5  ;;  %v2536_v5 = vsel %vm644_vm7, %v2528_v21, -inf  ;;  %v2537_v17 = vsel %vm644_vm7, %v2529_v16, -inf }
 0x741   : > { %v3498_v3 = vpop.eup %3497  ;;  %v2352_v61 = vmul.f32 0.6931472, %v3496_v63  ;;  %v2532_v11 = vadd.f32 %v2524_v60, %v2358_v29 }
 0x742   : > { %v2350_v31 = vmul.f32 0.6931472, %v3498_v3  ;;  %v2531_v59 = vadd.f32 %v2523_v32, %v2357_v13 }
 0x743   : > { %v2360_v45 = vadd.f32 %v2352_v61, %v4516_v10  ;;  %v2541_v36 = vsel %vm644_vm7, %v2532_v11, -inf  ;;  %v2538_v10 = vsel %vm644_vm7, %v2530_v6, -inf }
 0x744   : > { %v2359_v9 = vadd.f32 %v2350_v31, %v4518_v47  ;;  %v2539_v50 = vsel %vm644_vm7, %v2531_v59, -inf  ;;  %v2542_v8 = vmax.f32 %v2536_v5, %v2541_v36 }
 0x745   : > { %v2540_v14 = vmax.f32 %v2535_v62, %v2539_v50  ;;  %v2534_v30 = vadd.f32 %v2526_v42, %v2360_v45 }
 0x746   : > { %v2533_v44 = vadd.f32 %v2525_v58, %v2359_v9 }
 0x747   : > { %v2545_v52 = vsel %vm644_vm7, %v2534_v30, -inf  ;;  %v2547_v15 = vmax.f32 %v2540_v14, %v2542_v8 }
 0x748   : > { %v2543_v47 = vsel %vm644_vm7, %v2533_v44, -inf  ;;  %v2546_v4 = vmax.f32 %v2538_v10, %v2545_v52 }
 0x749   : > { %v2544_v1 = vmax.f32 %v2537_v17, %v2543_v47 }
 0x74b   : > { %v2548_v27 = vmax.f32 %v2544_v1, %v2546_v4 }
 0x74d   : > { %v2549_v18 = vmax.f32 %v2547_v15, %v2548_v27 }
 0x74f   : > { %v2550_v55 = vrot.slane %v2549_v18, 4 }
 0x751   : > { %v2551_v0 = vmax.f32 %v2549_v18, %v2550_v55 }
 0x753   : > { %v2552_v33 = vrot.slane %v2551_v0, 2 }
 0x755   : > { %v2553_v48 = vmax.f32 %v2551_v0, %v2552_v33 }
 0x757   : > { %v2554_v43 = vrot.slane %v2553_v48, 1 }
 0x759   : > { %v2555_v54 = vmax.f32 %v2553_v48, %v2554_v43 }
 0x75b   : > { %v2556_v23 = vsub.f32 %v2527_v22, %v2555_v54  ;;  %v2557_v39 = vsub.f32 %v2528_v21, %v2555_v54  ;;  %v2558_v35 = vsub.f32 %v2529_v16, %v2555_v54  ;;  %v2559_v56 = vsub.f32 %v2530_v6, %v2555_v54 }
 0x75c   : > { %v2560_v37 = vsub.f32 %v2531_v59, %v2555_v54  ;;  %v2561_v25 = vsub.f32 %v2532_v11, %v2555_v54  ;;  %v2562_v53 = vsub.f32 %v2533_v44, %v2555_v54  ;;  %v2563_v51 = vsub.f32 %v2534_v30, %v2555_v54 }
 0x75d   : > { %v2564_v46 = vmul.f32 1.442695, %v2556_v23  ;;  %v2566_v24 = vmul.f32 1.442695, %v2557_v39  ;;  %v2568_v38 = vmul.f32 1.442695, %v2558_v35 }
 0x75e   : > { %v2570_v2 = vmul.f32 1.442695, %v2559_v56  ;;  %v2572_v57 = vmul.f32 1.442695, %v2560_v37  ;;  %v2574_v28 = vmul.f32 1.442695, %v2561_v25 }
 0x75f   : > { %3499 = vpow2.f32 %v2564_v46  ;;  %v2576_v12 = vmul.f32 1.442695, %v2562_v53  ;;  %v2578_v26 = vmul.f32 1.442695, %v2563_v51 }
 0x760   : > { %3501 = vpow2.f32 %v2566_v24 }
 0x761   : > { %3503 = vpow2.f32 %v2568_v38 }
 0x762   : > { %3505 = vpow2.f32 %v2570_v2 }
 0x763   : > { %3507 = vpow2.f32 %v2572_v57 }
 0x764   : > { %3509 = vpow2.f32 %v2574_v28 }
 0x765   : > { %3511 = vpow2.f32 %v2576_v12 }
 0x766   : > { %3513 = vpow2.f32 %v2578_v26 }
 0x769   : > { %v3500_v20 = vpop.eup %3499 }
 0x76a   : > { %v3502_v40 = vpop.eup %3501  ;;  %v2580_v34 = vsel %vm644_vm7, %v3500_v20, 0.0 }
 0x76b   : > { %v3504_v60 = vpop.eup %3503  ;;  %v2581_v21 = vsel %vm644_vm7, %v3502_v40, 0.0 }
 0x76c   : > { %v3506_v19 = vpop.eup %3505  ;;  %v2582_v29 = vadd.f32 %v2581_v21, %v2580_v34  ;;  %v2583_v32 = vsel %vm644_vm7, %v3504_v60, 0.0 }
 0x76d   : > { %v3508_v22 = vpop.eup %3507  ;;  %v2585_v7 = vsel %vm644_vm7, %v3506_v19, 0.0 }
 0x76e   : > { %v2584_v63 = vadd.f32 %v2583_v32, %v2582_v29  ;;  %v3510_v13 = vpop.eup %3509  ;;  %v2587_v61 = vsel %vm644_vm7, %v3508_v22, 0.0 }
 0x76f   : > { %v3512_v49 = vpop.eup %3511  ;;  %v2589_v11 = vsel %vm644_vm7, %v3510_v13, 0.0 }
 0x770   : > { %v2586_v3 = vadd.f32 %v2585_v7, %v2584_v63  ;;  %v3514_v31 = vpop.eup %3513  ;;  %v2591_v42 = vsel %vm644_vm7, %v3512_v49, 0.0 }
 0x771   : > { %v2593_v45 = vsel %vm644_vm7, %v3514_v31, 0.0 }
 0x772   : > { %v2588_v41 = vadd.f32 %v2587_v61, %v2586_v3 }
 0x774   : > { %v2590_v59 = vadd.f32 %v2589_v11, %v2588_v41 }
 0x776   : > { %v2592_v5 = vadd.f32 %v2591_v42, %v2590_v59 }
 0x778   : > { %v2594_v62 = vadd.f32 %v2593_v45, %v2592_v5 }
 0x77a   : > { %v2595_v6 = vrot.slane %v2594_v62, 4 }
 0x77c   : > { %v2596_v36 = vadd.f32 %v2595_v6, %v2594_v62 }
 0x77e   : > { %v2597_v9 = vrot.slane %v2596_v36, 2 }
 0x780   : > { %v2598_v16 = vadd.f32 %v2597_v9, %v2596_v36 }
 0x782   : > { %v2599_v50 = vrot.slane %v2598_v16, 1 }
 0x784   : > { %v2600_v8 = vadd.f32 %v2599_v50, %v2598_v16 }
 0x786   : > { %3515 = vlog2.f32 %v2600_v8 }
 0x790   : > { %v3516_v58 = vpop.eup %3515 }
 0x791   : > { %v2602_v14 = vmul.f32 0.6931472, %v3516_v58 }
 0x793   : > { %v2603_v30 = vadd.f32 %v2602_v14, %v2555_v54 }
 0x795   : > { %v2609_v44 = vsel %vm644_vm7, %v2603_v30, -inf  ;;  %2605 = vst.msk [vmem:[#allocation2] sm:$0x1] %vm394_vm0, %v2603_v30 }
 0x796   : > { %2610 = vmax.xlane.f32.xlu1 %v2609_v44 }
 0x823   : > { %v2611_v10 = vpop.xlane.xlu1 %2610 }
 0x824   : > { %v2612_v52 = vsub.f32 %v2603_v30, %v2611_v10 }
 0x826   : > { %v2613_v15 = vmul.f32 1.442695, %v2612_v52 }
 0x828   : > { %3517 = vpow2.f32 %v2613_v15 }
 0x832   : > { %v3518_v17 = vpop.eup %3517 }
 0x833   : > { %v2615_v47 = vsel %vm644_vm7, %v3518_v17, 0.0 }
 0x834   : > { %2616 = vadd.xlane.f32.xlu0 %v2615_v47 }
 0x8c1   : > { %v2617_v4 = vpop.xlane.xlu0 %2616 }
 0x8c2   : > { %3519 = vlog2.f32 %v2617_v4 }
 0x8cc   : > { %v3520_v1 = vpop.eup %3519 }
 0x8cd   : > { %v2619_v27 = vmul.f32 0.6931472, %v3520_v1 }
 0x8cf   : > { %v2620_v18 = vadd.f32 %v2619_v27, %v2611_v10 }
 0x8d1   : > { %2622 = vst.msk [vmem:[%s360_s28] sm:$0x1] %vm2621_vm13, %v2620_v18 }
 0x8d2 PF: > { %s15_s20 = sadd.s32 1, %s3543_s20   ;;  %s4633_s18 = smov %s3539_s19 }
 0x8d3   : > { %p12_p5 = scmp.ge.s32.totalorder %s15_s20, 4   ;;  %s4634_s19 = smov %s4636_s21 }
 0x8d5   :  { %14 = sbr.rel (!%p12_p5) target bundleno = 2 (0x2), region = 104 }

</bundles_post_ra>
